<compile_context>
chip_gen: v7x
topology: tpu7x:2x2x1
jax: 0.10.0
libtpu: 0.0.40
codegen_flags: <defaults>
</compile_context>

<pallas_src>
import functools

import jax
import jax.numpy as jnp
from jax.experimental import pallas as pl
from jax.experimental.pallas import tpu as pltpu


# ---------------------------------------------------------------------------
# Kernel 1: one pass over A_hat.
#   - accumulates AX[i]  = sum_k A[i,k] @ X[k]           (conv1, reordered)
#   - accumulates PA[:,k] = sum_i P[:,i] @ A[i,k]         (mean-pool @ A, fused)
#   - at the end of each row block: HW[i] = relu(AX[i]@W1 + b1) @ W2
# Grid = (row blocks i, column blocks k); k (reduction) is the last/innermost axis.
# ---------------------------------------------------------------------------
def conv_stack_kernel(a_ref, x_ref, p_ref, w1_ref, b1_ref, w2_ref,
                      hw_ref, pa_ref, acc_ref):
    i = pl.program_id(0)
    k = pl.program_id(1)
    nk = pl.num_programs(1)
    tile = a_ref.shape[1]

    a = a_ref[...]                                            # (tm, tk) bf16

    # ---- conv1 partial sum:  AX[i] += A[i,k] @ X[k]  -------------------------
    @pl.when(k == 0)
    def _():
        acc_ref[...] = jnp.zeros_like(acc_ref)

    acc_ref[...] += jnp.dot(a, x_ref[...], preferred_element_type=jnp.float32)

    # ---- fused pooling partial sum:  PA[:, k] += P[:, i] @ A[i, k] ------------
    pa_blk = jnp.dot(p_ref[...], a, preferred_element_type=jnp.float32)  # (G, tk)
    col = pl.ds(pl.multiple_of(k * tile, tile), tile)

    @pl.when(i == 0)
    def _():
        pa_ref[:, col] = pa_blk

    @pl.when(i > 0)
    def _():
        pa_ref[:, col] = pa_ref[:, col] + pa_blk

    # ---- finalize row block:  HW[i] = relu(AX[i] @ W1 + b1) @ W2 --------------
    @pl.when(k == nk - 1)
    def _():
        h1 = jnp.dot(acc_ref[...].astype(jnp.bfloat16), w1_ref[...],
                     preferred_element_type=jnp.float32) + b1_ref[...]
        h1 = jnp.maximum(h1, 0.0)
        # TODO(synk): training-mode dropout (p=0.5) omitted (eval-mode identity);
        #             use pltpu.prng_seed + pltpu.prng_random_bits if training.
        hw = jnp.dot(h1.astype(jnp.bfloat16), w2_ref[...],
                     preferred_element_type=jnp.float32)
        hw_ref[...] = hw.astype(hw_ref.dtype)


# ---------------------------------------------------------------------------
# Kernel 2: tiny head.  pooled = PA @ HW + b2 ; logits = pooled @ Wl + bl ;
# mask padded expert lanes to -inf ; log_softmax.   Grid = (column blocks k,).
# ---------------------------------------------------------------------------
def head_kernel(pa_ref, hw_ref, b2_ref, wl_ref, bl_ref, o_ref, acc_ref,
                *, num_experts):
    k = pl.program_id(0)
    nk = pl.num_programs(0)

    @pl.when(k == 0)
    def _():
        acc_ref[...] = jnp.zeros_like(acc_ref)

    acc_ref[...] += jnp.dot(pa_ref[...].astype(jnp.bfloat16), hw_ref[...],
                            preferred_element_type=jnp.float32)

    @pl.when(k == nk - 1)
    def _():
        # b2 commutes through mean pooling because each pooling row sums to 1.
        pooled = acc_ref[...] + b2_ref[...]                                   # (G, HP)
        logits = jnp.dot(pooled.astype(jnp.bfloat16), wl_ref[...],
                         preferred_element_type=jnp.float32) + bl_ref[...]    # (G, EP)
        lane = jax.lax.broadcasted_iota(jnp.int32, logits.shape, 1)
        logits = jnp.where(lane < num_experts, logits, -jnp.inf)              # mask pad
        m = jnp.max(logits, axis=1, keepdims=True)
        s = logits - m
        lse = jnp.log(jnp.sum(jnp.exp(s), axis=1, keepdims=True))
        o_ref[...] = (s - lse).astype(o_ref.dtype)


# ---------------------------------------------------------------------------
# Plain-JAX glue: normalized dense adjacency, pooling matrix, padding, calls.
# ---------------------------------------------------------------------------
def gcn_norm_dense_adj(edge_index, num_nodes):
    """A_hat = D^-1/2 (A + I) D^-1/2 as a dense (N, N) matrix (PyG gcn_norm)."""
    src, dst = edge_index[0], edge_index[1]
    loop = jnp.arange(num_nodes, dtype=src.dtype)
    src = jnp.concatenate([src, loop])
    dst = jnp.concatenate([dst, loop])
    deg = jnp.zeros((num_nodes,), jnp.float32).at[dst].add(1.0)
    dinv = jnp.where(deg > 0, 1.0 / jnp.sqrt(deg), 0.0)
    vals = dinv[src] * dinv[dst]
    return jnp.zeros((num_nodes, num_nodes), jnp.float32).at[dst, src].add(vals)


def mean_pool_matrix(batch, num_graphs):
    """P[g, i] = 1/|{j: batch[j]==g}| if batch[i]==g else 0."""
    onehot = (batch[None, :] == jnp.arange(num_graphs)[:, None]).astype(jnp.float32)
    counts = jnp.maximum(onehot.sum(axis=1, keepdims=True), 1.0)
    return onehot / counts


def _round_up(x, m):
    return ((x + m - 1) // m) * m


def _pad2(a, rows, cols):
    return jnp.pad(a, ((0, rows - a.shape[0]), (0, cols - a.shape[1])))


def gating_gcn_forward(x, edge_index, batch, params, num_graphs, *, tile=128):
    # tile: 128 for small demos; raise to 256-512 for large N (stay under 64 MiB
    # VMEM on v7x with the bf16 double-buffered A row/col blocks).
    n, fdim = x.shape
    hidden = params["w1"].shape[1]
    experts = params["wl"].shape[1]
    hp = _round_up(hidden, 128)        # lane-dense hidden
    ep = _round_up(experts, 128)       # lane-dense experts
    np_ = _round_up(n, tile)           # padded node count
    ni = np_ // tile
    nk = np_ // tile
    g = num_graphs

    # Dense graph operators (zero padding of A/P/X is exact for this pipeline).
    a_p = _pad2(gcn_norm_dense_adj(edge_index, n), np_, np_).astype(jnp.bfloat16)
    p_p = _pad2(mean_pool_matrix(batch, g), g, np_).astype(jnp.bfloat16)
    x_p = _pad2(x, np_, fdim).astype(jnp.bfloat16)

    # Zero-padded, lane-dense weights / biases.
    w1 = _pad2(params["w1"], fdim, hp).astype(jnp.bfloat16)
    b1 = _pad2(params["b1"].reshape(1, -1), 1, hp).astype(jnp.float32)
    w2 = _pad2(params["w2"], hp, hp).astype(jnp.bfloat16)
    b2 = _pad2(params["b2"].reshape(1, -1), 1, hp).astype(jnp.float32)
    wl = _pad2(params["wl"], hp, ep).astype(jnp.bfloat16)
    bl = _pad2(params["bl"].reshape(1, -1), 1, ep).astype(jnp.float32)

    vmem_limit = 64 * 1024 * 1024

    # ---- pass 1: single sweep over A_hat -------------------------------------
    hw, pa = pl.pallas_call(
        conv_stack_kernel,
        out_shape=(jax.ShapeDtypeStruct((np_, hp), jnp.bfloat16),   # HW = relu(..)@W2
                   jax.ShapeDtypeStruct((g, np_), jnp.float32)),    # PA = P @ A_hat
        grid_spec=pltpu.PrefetchScalarGridSpec(
            num_scalar_prefetch=0,
            grid=(ni, nk),
            in_specs=[
                pl.BlockSpec((tile, tile), lambda i, k: (i, k)),    # A_hat block
                pl.BlockSpec((tile, fdim), lambda i, k: (k, 0)),    # X (source rows)
                pl.BlockSpec((g, tile), lambda i, k: (0, i)),       # P (dest cols)
                pl.BlockSpec((fdim, hp), lambda i, k: (0, 0)),      # W1
                pl.BlockSpec((1, hp), lambda i, k: (0, 0)),         # b1
                pl.BlockSpec((hp, hp), lambda i, k: (0, 0)),        # W2
            ],
            out_specs=(
                pl.BlockSpec((tile, hp), lambda i, k: (i, 0)),      # HW row block
                pl.BlockSpec((g, np_), lambda i, k: (0, 0)),        # PA (resident acc)
            ),
            scratch_shapes=[pltpu.VMEM((tile, fdim), jnp.float32)],
        ),
        compiler_params=pltpu.CompilerParams(
            # Both axes carry accumulation (PA over rows, AX over cols) -> arbitrary.
            dimension_semantics=("arbitrary", "arbitrary"),
            vmem_limit_bytes=vmem_limit,
        ),
    )(a_p, x_p, p_p, w1, b1, w2)

    # ---- pass 2: tiny head over the node dimension ---------------------------
    out_padded = pl.pallas_call(
        functools.partial(head_kernel, num_experts=experts),
        out_shape=jax.ShapeDtypeStruct((g, ep), jnp.float32),
        grid_spec=pltpu.PrefetchScalarGridSpec(
            num_scalar_prefetch=0,
            grid=(nk,),
            in_specs=[
                pl.BlockSpec((g, tile), lambda k: (0, k)),          # PA block
                pl.BlockSpec((tile, hp), lambda k: (k, 0)),         # HW block
                pl.BlockSpec((1, hp), lambda k: (0, 0)),            # b2
                pl.BlockSpec((hp, ep), lambda k: (0, 0)),           # Wl
                pl.BlockSpec((1, ep), lambda k: (0, 0)),            # bl
            ],
            out_specs=pl.BlockSpec((g, ep), lambda k: (0, 0)),
            scratch_shapes=[pltpu.VMEM((g, hp), jnp.float32)],
        ),
        compiler_params=pltpu.CompilerParams(
            dimension_semantics=("arbitrary",),
            vmem_limit_bytes=vmem_limit,
        ),
    )(pa, hw, b2, wl, bl)

    return out_padded[:, :experts]


# ---------------------------------------------------------------------------
# Pure-JAX f32 reference (original op order) for a sanity check.
# ---------------------------------------------------------------------------
def reference_forward(x, edge_index, batch, params, num_graphs):
    a = gcn_norm_dense_adj(edge_index, x.shape[0])
    p = mean_pool_matrix(batch, num_graphs)
    h1 = jnp.maximum(a @ (x @ params["w1"]) + params["b1"], 0.0)
    h2 = a @ (h1 @ params["w2"]) + params["b2"]
    z = h2 @ params["wl"] + params["bl"]
    pooled = p @ z
    return jax.nn.log_softmax(pooled, axis=1)


if __name__ == "__main__":
    # input_dim=8, hidden_channels=32, num_experts=4; 2 graphs x 128 nodes
    # -> 256 padded nodes -> a 2x2 grid of 128-tiles (exercises the pipeline).
    input_dim, hidden, num_experts = 8, 32, 4
    nodes_per_graph, num_graphs = 128, 2
    n_nodes = nodes_per_graph * num_graphs

    key = jax.random.PRNGKey(0)
    k_x, k_w1, k_w2, k_wl = jax.random.split(key, 4)

    params = {
        "w1": jax.random.normal(k_w1, (input_dim, hidden), jnp.float32) * 0.1,
        "b1": jnp.zeros((1, hidden), jnp.float32),
        "w2": jax.random.normal(k_w2, (hidden, hidden), jnp.float32) * 0.1,
        "b2": jnp.full((1, hidden), 0.01, jnp.float32),
        "wl": jax.random.normal(k_wl, (hidden, num_experts), jnp.float32) * 0.1,
        "bl": jnp.full((1, num_experts), 0.02, jnp.float32),
    }

    x = jax.random.normal(k_x, (n_nodes, input_dim), jnp.float32)

    # Two disjoint undirected ring graphs (block-diagonal batched adjacency).
    edge_parts = []
    for gi in range(num_graphs):
        base = gi * nodes_per_graph
        s = jnp.arange(nodes_per_graph, dtype=jnp.int32) + base
        d = (jnp.arange(nodes_per_graph, dtype=jnp.int32) + 1) % nodes_per_graph + base
        edge_parts.append(jnp.stack([jnp.concatenate([s, d]),
                                     jnp.concatenate([d, s])], axis=0))
    edge_index = jnp.concatenate(edge_parts, axis=1)

    batch = jnp.repeat(jnp.arange(num_graphs, dtype=jnp.int32), nodes_per_graph)

    out = gating_gcn_forward(x, edge_index, batch, params, num_graphs, tile=128)
    out = jax.block_until_ready(out)

    ref = reference_forward(x, edge_index, batch, params, num_graphs)
    assert out.shape == (num_graphs, num_experts)
    assert jnp.allclose(jnp.exp(out).sum(axis=1), 1.0, atol=1e-3)
    assert jnp.allclose(out, ref, atol=3e-2, rtol=3e-2), (out, ref)

    print("KERNEL_OK")
</pallas_src>

<mosaic_0001>
module attributes {stable_mosaic.version = 11 : i64} {
  func.func @conv_stack_kernel(%arg0: i32, %arg1: i32, %arg2: memref<128x128xbf16, #tpu.memory_space<vmem>>, %arg3: memref<128x8xbf16, #tpu.memory_space<vmem>>, %arg4: memref<2x128xbf16, #tpu.memory_space<vmem>>, %arg5: memref<8x128xbf16, #tpu.memory_space<vmem>>, %arg6: memref<1x128xf32, #tpu.memory_space<vmem>>, %arg7: memref<128x128xbf16, #tpu.memory_space<vmem>>, %arg8: memref<128x128xbf16, #tpu.memory_space<vmem>>, %arg9: memref<2x256xf32, #tpu.memory_space<vmem>>, %arg10: memref<128x8xf32, #tpu.memory_space<vmem>>) attributes {dimension_semantics = [#tpu.dimension_semantics<arbitrary>, #tpu.dimension_semantics<arbitrary>], iteration_bounds = array<i64: 2, 2>, scalar_prefetch = 0 : i64, scratch_operands = 1 : i64, tpu.core_type = #tpu.core_type<tc>, window_params = [{transform_indices = @transform_0, window_bounds = array<i64: 128, 128>}, {transform_indices = @transform_1, window_bounds = array<i64: 128, 8>}, {transform_indices = @transform_2, window_bounds = array<i64: 2, 128>}, {pipeline_mode = #tpu.pipeline_mode<synchronous>, transform_indices = @transform_3, window_bounds = array<i64: 8, 128>}, {pipeline_mode = #tpu.pipeline_mode<synchronous>, transform_indices = @transform_4, window_bounds = array<i64: 1, 128>}, {pipeline_mode = #tpu.pipeline_mode<synchronous>, transform_indices = @transform_5, window_bounds = array<i64: 128, 128>}, {transform_indices = @transform_6, window_bounds = array<i64: 128, 128>}, {pipeline_mode = #tpu.pipeline_mode<synchronous>, transform_indices = @transform_7, window_bounds = array<i64: 2, 256>}]} {
    %c0 = arith.constant 0 : index
    %c0_0 = arith.constant 0 : index
    %0 = vector.load %arg2[%c0, %c0_0] : memref<128x128xbf16, #tpu.memory_space<vmem>>, vector<128x128xbf16>
    %c0_i32 = arith.constant 0 : i32
    %1 = arith.cmpi eq, %arg1, %c0_i32 : i32
    %2 = arith.extui %1 : i1 to i32
    %c0_i32_1 = arith.constant 0 : i32
    %3 = arith.cmpi ne, %2, %c0_i32_1 : i32
    scf.if %3 {
      %cst_16 = arith.constant 0.000000e+00 : f32
      %22 = vector.broadcast %cst_16 : f32 to vector<128x8xf32>
      %c0_17 = arith.constant 0 : index
      %c0_18 = arith.constant 0 : index
      %23 = vector.load %arg10[%c0_17, %c0_18] : memref<128x8xf32, #tpu.memory_space<vmem>>, vector<128x8xf32>
      tpu.vector_store %arg10[%c0_17, %c0_18], %22 {strides = array<i32>} : memref<128x8xf32, #tpu.memory_space<vmem>>, vector<128x8xf32>,
    } else {
    }
    %c0_2 = arith.constant 0 : index
    %c0_3 = arith.constant 0 : index
    %4 = vector.load %arg10[%c0_2, %c0_3] : memref<128x8xf32, #tpu.memory_space<vmem>>, vector<128x8xf32>
    %c0_4 = arith.constant 0 : index
    %c0_5 = arith.constant 0 : index
    %5 = vector.load %arg3[%c0_4, %c0_5] : memref<128x8xbf16, #tpu.memory_space<vmem>>, vector<128x8xbf16>
    %cst = arith.constant dense<0.000000e+00> : vector<128x8xf32>
    %6 = tpu.matmul %0, %5, %cst {dimension_numbers = #tpu.dot_dimension_numbers<[1], [0], [0], [1], [0, 0, 1, 1], [], []>} : vector<128x128xbf16>, vector<128x8xbf16>, vector<128x8xf32> -> vector<128x8xf32>
    %7 = arith.addf %4, %6 : vector<128x8xf32>
    %c0_6 = arith.constant 0 : index
    %c0_7 = arith.constant 0 : index
    %8 = vector.load %arg10[%c0_6, %c0_7] : memref<128x8xf32, #tpu.memory_space<vmem>>, vector<128x8xf32>
    tpu.vector_store %arg10[%c0_6, %c0_7], %7 {strides = array<i32>} : memref<128x8xf32, #tpu.memory_space<vmem>>, vector<128x8xf32>,
    %c0_8 = arith.constant 0 : index
    %c0_9 = arith.constant 0 : index
    %9 = vector.load %arg4[%c0_8, %c0_9] : memref<2x128xbf16, #tpu.memory_space<vmem>>, vector<2x128xbf16>
    %cst_10 = arith.constant dense<0.000000e+00> : vector<2x128xf32>
    %10 = tpu.matmul %9, %0, %cst_10 {dimension_numbers = #tpu.dot_dimension_numbers<[1], [0], [0], [1], [0, 0, 1, 1], [], []>} : vector<2x128xbf16>, vector<128x128xbf16>, vector<2x128xf32> -> vector<2x128xf32>
    %c128_i32 = arith.constant 128 : i32
    %11 = arith.muli %arg1, %c128_i32 : i32
    %12 = tpu.assume_multiple %11, 128 : i32
    %c0_i32_11 = arith.constant 0 : i32
    %13 = arith.cmpi eq, %arg0, %c0_i32_11 : i32
    %14 = arith.extui %13 : i1 to i32
    %c0_i32_12 = arith.constant 0 : i32
    %15 = arith.cmpi ne, %14, %c0_i32_12 : i32
    scf.if %15 {
      %c0_16 = arith.constant 0 : index
      %22 = arith.index_cast %12 : i32 to index
      %23 = vector.load %arg9[%c0_16, %22] : memref<2x256xf32, #tpu.memory_space<vmem>>, vector<2x128xf32>
      tpu.vector_store %arg9[%c0_16, %22], %10 {strides = array<i32>} : memref<2x256xf32, #tpu.memory_space<vmem>>, vector<2x128xf32>,
    } else {
    }
    %c0_i32_13 = arith.constant 0 : i32
    %16 = arith.cmpi sgt, %arg0, %c0_i32_13 : i32
    %17 = arith.extui %16 : i1 to i32
    %c0_i32_14 = arith.constant 0 : i32
    %18 = arith.cmpi ne, %17, %c0_i32_14 : i32
    scf.if %18 {
      %c0_16 = arith.constant 0 : index
      %22 = arith.index_cast %12 : i32 to index
      %23 = vector.load %arg9[%c0_16, %22] : memref<2x256xf32, #tpu.memory_space<vmem>>, vector<2x128xf32>
      %24 = arith.addf %23, %10 : vector<2x128xf32>
      %c0_17 = arith.constant 0 : index
      %25 = arith.index_cast %12 : i32 to index
      %26 = vector.load %arg9[%c0_17, %25] : memref<2x256xf32, #tpu.memory_space<vmem>>, vector<2x128xf32>
      tpu.vector_store %arg9[%c0_17, %25], %24 {strides = array<i32>} : memref<2x256xf32, #tpu.memory_space<vmem>>, vector<2x128xf32>,
    } else {
    }
    %c1_i32 = arith.constant 1 : i32
    %19 = arith.cmpi eq, %arg1, %c1_i32 : i32
    %20 = arith.extui %19 : i1 to i32
    %c0_i32_15 = arith.constant 0 : i32
    %21 = arith.cmpi ne, %20, %c0_i32_15 : i32
    scf.if %21 {
      %c0_16 = arith.constant 0 : index
      %c0_17 = arith.constant 0 : index
      %22 = vector.load %arg10[%c0_16, %c0_17] : memref<128x8xf32, #tpu.memory_space<vmem>>, vector<128x8xf32>
      %23 = arith.truncf %22 : vector<128x8xf32> to vector<128x8xbf16>
      %c0_18 = arith.constant 0 : index
      %c0_19 = arith.constant 0 : index
      %24 = vector.load %arg5[%c0_18, %c0_19] : memref<8x128xbf16, #tpu.memory_space<vmem>>, vector<8x128xbf16>
      %cst_20 = arith.constant dense<0.000000e+00> : vector<128x128xf32>
      %25 = tpu.matmul %23, %24, %cst_20 {dimension_numbers = #tpu.dot_dimension_numbers<[1], [0], [0], [1], [0, 0, 1, 1], [], []>} : vector<128x8xbf16>, vector<8x128xbf16>, vector<128x128xf32> -> vector<128x128xf32>
      %c0_21 = arith.constant 0 : index
      %c0_22 = arith.constant 0 : index
      %26 = vector.load %arg6[%c0_21, %c0_22] : memref<1x128xf32, #tpu.memory_space<vmem>>, vector<1x128xf32>
      %27 = vector.broadcast %26 : vector<1x128xf32> to vector<128x128xf32>
      %28 = arith.addf %25, %27 : vector<128x128xf32>
      %cst_23 = arith.constant 0.000000e+00 : f32
      %29 = vector.broadcast %cst_23 : f32 to vector<128x128xf32>
      %30 = arith.maximumf %28, %29 : vector<128x128xf32>
      %31 = arith.truncf %30 : vector<128x128xf32> to vector<128x128xbf16>
      %c0_24 = arith.constant 0 : index
      %c0_25 = arith.constant 0 : index
      %32 = vector.load %arg7[%c0_24, %c0_25] : memref<128x128xbf16, #tpu.memory_space<vmem>>, vector<128x128xbf16>
      %cst_26 = arith.constant dense<0.000000e+00> : vector<128x128xf32>
      %33 = tpu.matmul %31, %32, %cst_26 {dimension_numbers = #tpu.dot_dimension_numbers<[1], [0], [0], [1], [0, 0, 1, 1], [], []>} : vector<128x128xbf16>, vector<128x128xbf16>, vector<128x128xf32> -> vector<128x128xf32>
      %34 = arith.truncf %33 : vector<128x128xf32> to vector<128x128xbf16>
      %c0_27 = arith.constant 0 : index
      %c0_28 = arith.constant 0 : index
      %35 = vector.load %arg8[%c0_27, %c0_28] : memref<128x128xbf16, #tpu.memory_space<vmem>>, vector<128x128xbf16>
      tpu.vector_store %arg8[%c0_27, %c0_28], %34 {strides = array<i32>} : memref<128x128xbf16, #tpu.memory_space<vmem>>, vector<128x128xbf16>,
    } else {
    }
    return
  }
  func.func @transform_0(%arg0: i32, %arg1: i32) -> (i32, i32) {
    %c0_i32 = arith.constant 0 : i32
    return %arg0, %arg1 : i32, i32
  }
  func.func @transform_1(%arg0: i32, %arg1: i32) -> (i32, i32) {
    %c0_i32 = arith.constant 0 : i32
    %c0_i32_0 = arith.constant 0 : i32
    return %arg1, %c0_i32 : i32, i32
  }
  func.func @transform_2(%arg0: i32, %arg1: i32) -> (i32, i32) {
    %c0_i32 = arith.constant 0 : i32
    %c0_i32_0 = arith.constant 0 : i32
    return %c0_i32, %arg0 : i32, i32
  }
  func.func @transform_3(%arg0: i32, %arg1: i32) -> (i32, i32) {
    %c0_i32 = arith.constant 0 : i32
    %c0_i32_0 = arith.constant 0 : i32
    %c0_i32_1 = arith.constant 0 : i32
    return %c0_i32, %c0_i32_0 : i32, i32
  }
  func.func @transform_4(%arg0: i32, %arg1: i32) -> (i32, i32) {
    %c0_i32 = arith.constant 0 : i32
    %c0_i32_0 = arith.constant 0 : i32
    %c0_i32_1 = arith.constant 0 : i32
    return %c0_i32, %c0_i32_0 : i32, i32
  }
  func.func @transform_5(%arg0: i32, %arg1: i32) -> (i32, i32) {
    %c0_i32 = arith.constant 0 : i32
    %c0_i32_0 = arith.constant 0 : i32
    %c0_i32_1 = arith.constant 0 : i32
    return %c0_i32, %c0_i32_0 : i32, i32
  }
  func.func @transform_6(%arg0: i32, %arg1: i32) -> (i32, i32) {
    %c0_i32 = arith.constant 0 : i32
    %c0_i32_0 = arith.constant 0 : i32
    return %arg0, %c0_i32 : i32, i32
  }
  func.func @transform_7(%arg0: i32, %arg1: i32) -> (i32, i32) {
    %c0_i32 = arith.constant 0 : i32
    %c0_i32_0 = arith.constant 0 : i32
    %c0_i32_1 = arith.constant 0 : i32
    return %c0_i32, %c0_i32_0 : i32, i32
  }
}

</mosaic_0001>

<bundles_post_ra>
// kernel: tpu_custom_call.1
= control target key start
LH: loop header
LB: loop body
LE: loop exit
PB: predicated region body
PF: predicated region fallthrough
CT: control target
= control target key end

     0   :  { %s2972_s0 = inlined_call_operand.hbm [shape: bf16[256,256], index: 0, kind: input, shape index: {}]   ;;  %s2973_s1 = inlined_call_operand.hbm [shape: bf16[256,8], index: 1, kind: input, shape index: {}]   ;;  %s2974_s2 = inlined_call_operand.hbm [shape: bf16[2,256], index: 2, kind: input, shape index: {}]   ;;  %s2975_s3 = inlined_call_operand.hbm [shape: bf16[8,128], index: 3, kind: input, shape index: {}]   ;;  %s2976_s4 = inlined_call_operand.hbm [shape: f32[1,128], index: 4, kind: input, shape index: {}]   ;;  %s2977_s5 = inlined_call_operand.hbm [shape: bf16[128,128], index: 5, kind: input, shape index: {}]   ;;  %s2978_s6 = inlined_call_operand.hbm [shape: bf16[256,128], index: 6, kind: output, shape index: {0}]   ;;  %s2979_s7 = inlined_call_operand.hbm [shape: f32[2,256], index: 7, kind: output, shape index: {1}]  }
   0x1   :  { %3002 = sst [smem:[#allocation33_spill]] %s2973_s1 }
   0x2   :  { %3003 = sst [smem:[#allocation34_spill]] %s2974_s2 }
   0x3   :  { %3004 = sst [smem:[#allocation35_spill]] %s2975_s3 }
   0x4   :  { %3005 = sst [smem:[#allocation36_spill]] %s2978_s6 }
   0x5   :  { %3006 = sst [smem:[#allocation37_spill]] %s2979_s7 }
   0x6   :  { %13 = vsyncpa [#allocation4], 0 }
   0x7   :  { %15 = vsyncpa [#allocation4 + $0x1], 0 }
   0x8   :  { %16 = vsyncpa [#allocation7], 0 }
   0x9   :  { %18 = vsyncpa [#allocation7 + $0x1], 0 }
   0xa   :  { %19 = vsyncpa [#allocation10], 0 }
   0xb   :  { %20 = vsyncpa [#allocation13], 0 }
   0xc   :  { %21 = vsyncpa [#allocation5], 0 }
   0xd   :  { %23 = vsyncpa [#allocation5 + $0x1], 0 }
   0xe   :  { %24 = vsyncpa [#allocation16], 0  ;;  %s2347_s24 = smov 0   ;;  %s2349_s25 = smov 0  }
   0xf   :  { %s2351_s26 = smov 0   ;;  %s2353_s27 = smov 0  }
  0x10   :  { %s2355_s28 = smov 0   ;;  %s2357_s29 = smov 0  }
  0x11   :  { %s2359_s30 = smov 0   ;;  %s2361_s8 = smov 0  }
  0x12   :  { %s2363_s9 = smov 0   ;;  %s2365_s10 = smov 0  }
  0x13   :  { %s2367_s11 = smov 0   ;;  %s2369_s12 = smov 0  }
  0x14   :  { %s2371_s13 = smov 0   ;;  %s2373_s14 = smov 0  }
  0x15 LB: > { %3007 = sst [smem:[#allocation24_spill]] %s2253_s28  ;;  %s2418_s15 = sadd.s32 4294967295, %s2289_s14   ;;  %s2289_s14 = sphi %s2373_s14, %s30_s14   ;;  %s2285_s13 = sphi %s2371_s13, %s3087_s13   ;;  %s2281_s12 = sphi %s2369_s12, %s3086_s12   ;;  %s2277_s11 = sphi %s2367_s11, %s3085_s11   ;;  %s2273_s10 = sphi %s2365_s10, %s3084_s10   ;;  %s2269_s9 = sphi %s2363_s9, %s3083_s9   ;;  %s2265_s8 = sphi %s2361_s8, %s3082_s8   ;;  %s2261_s30 = sphi %s2359_s30, %s3081_s30   ;;  %s2257_s29 = sphi %s2357_s29, %s3080_s29   ;;  %s2253_s28 = sphi %s2355_s28, %s3072_s28   ;;  %s2249_s27 = sphi %s2353_s27, %s3071_s27   ;;  %s2245_s26 = sphi %s2351_s26, %s3079_s26   ;;  %s2241_s25 = sphi %s2349_s25, %s3078_s25   ;;  %s2237_s24 = sphi %s2347_s24, %s3077_s24  }
  0x16   : > { %3008 = sst [smem:[#allocation25_spill]] %s2257_s29  ;;  %p1407_p0 = scmp.ge.s32.totalorder %s2289_s14, 1 }
  0x17   : > { %3009 = sst [smem:[#allocation26_spill]] %s2273_s10  ;;  %p2982_p1 = scmp.eq.s32.totalorder %s2418_s15, 0 }
  0x18   : > { %3010 = sst [smem:[#allocation27_spill]] %s2277_s11  ;;  %p237_p2 = scmp.lt.s32.totalorder %s2289_s14, 5 }
  0x19   : > { %s2291_s17 = smov [#allocation9]   ;;  %s3014_s3 = sld [smem:[#allocation35_spill]] }
  0x1a   : > { %p2423_p3 = pnand %p1407_p0, %p237_p2  ;;  %s250_s18 = sshll.u32 %s2291_s17, 4  ;;  %s251_s18 = int_to_ptr.vmem [resolvable:$true] %s250_s18 }
  0x1c   : > { %s3011_s16 = scalar_select %p2423_p3, 1, 0 }
  0x1d   : > { %p1749_p4 = pneg %p2423_p3 }
  0x1e   : > { %3012 = sst [smem:[#allocation28_spill]] %s3011_s16 }
  0x1f   : > { %p2431_p5 = pnand %p1749_p4, %p2982_p1  ;;  %s1923_s22 = scalar_lea.hbm %s3014_s3, 64 }
  0x20   : > { %p1924_p6 = scmp.ne.s32.totalorder %s3014_s3, %s1923_s22  ;;  %p1930_p10 = scmp.lt.u32.totalorder %s1923_s22, %s3014_s3 }
  0x21   : > { %s3013_s19 = scalar_select %p2431_p5, 1, 0 }
  0x22   : > { %p2443_p7 = pneg %p2431_p5 }
  0x24   : > { %p1926_p8 = pnand %p2443_p7, %p1924_p6 }
  0x26   : > { %p1927_p9 = pneg %p1926_p8 }
  0x28   : > { %p1932_p11 = pnand %p1930_p10, %p1927_p9 }
  0x2a   : > { %1935 = shalt.err (!%p1932_p11)
}
  0x2b   : > { %s1936_s20 = scalar_lea.vmem %s251_s18, 64  ;;  %p1944_p2 = scmp.lt.s32.totalorder %s251_s18, %s251_s18 }
  0x2c   : > { %p1937_p12 = scmp.ne.s32.totalorder %s251_s18, %s1936_s20  ;;  %p1945_p4 = scmp.lt.s32.totalorder %s1936_s20, %s1936_s20 }
  0x2e   : > { %p1939_p13 = pnand %p1937_p12, %p2443_p7  ;;  %p1946_p1 = por %p1945_p4, %p1944_p2 }
  0x30   : > { %p1940_p0 = pneg %p1939_p13 }
  0x32   : > { %p1947_p3 = pnand %p1946_p1, %p1940_p0 }
  0x34   : > { %1950 = shalt.err (!%p1947_p3)
}
  0x35   : > { %1752 = dma.hbm_to_vmem [thread:$0]  (!%p2431_p5), %s3014_s3, 64, %s251_s18, [#allocation10]  }
  0x36   : > { %s39_s6 = sadd.s32 1, %s2281_s12  ;;  %s42_s11 = sadd.s32 1, %s2285_s13 }
  0x37   : > { %p40_p1 = scmp.ge.s32.totalorder %s39_s6, 2  ;;  %p2993_p3 = scmp.eq.s32.totalorder %s2289_s14, 0 }
  0x38   : > { %s77_s22 = sadd.s32 1, %s2257_s29  ;;  %p84_p6 = scmp.ne.s32.totalorder %s2257_s29, %s2253_s28 }
  0x39   : > { %s3089_s6 = smov (%p40_p1, %s39_s6), 0  ;;  %s3091_s11 = smov (!%p40_p1, %s42_s11), %s2285_s13 }
  0x3a   : > { %3016 = sst [smem:[#allocation29_spill]] %s3089_s6  ;;  %s47_s23 = ssub.s32 %s2281_s12, %s3089_s6 }
  0x3b   : > { %p44_p8 = scmp.ge.s32.totalorder %s3091_s11, 2  ;;  %p75_p9 = scmp.eq.s32.totalorder %s47_s23, 0 }
  0x3c   : > { %p2472_p10 = por %p84_p6, %p2993_p3  ;;  %p90_p11 = scmp.ne.s32.totalorder %s2253_s28, %s2249_s27 }
  0x3d   : > { %s3093_s11 = smov (%p44_p8, %s3091_s11), 0  ;;  %p3020_p12 = scmp.eq.s32.totalorder %s2418_s15, 0 }
  0x3e   : > { %3018 = sst [smem:[#allocation30_spill]] %s3093_s11  ;;  %s2485_s7 = ssub.s32 %s2285_s13, %s3093_s11 }
  0x3f   : > { %s2481_s20 = scalar_select %p75_p9, %s2257_s29, %s77_s22  }
  0x40   : > { %p2489_p13 = por %p90_p11, %p3020_p12  ;;  %s48_s3 = sor.u32 %s47_s23, %s2485_s7 }
  0x41   : > { %3019 = sst [smem:[#allocation31_spill]] %s2481_s20  ;;  %p2494_p0 = scmp.eq.s32.totalorder %s48_s3, 0 }
  0x42   : > { %s3021_s21 = scalar_select %p2489_p13, 1, 0 }
  0x43   : > { %s3023_s6 = scalar_select %p2494_p0, 1, 0 }
  0x44   : > { %3022 = sst [smem:[#allocation32_spill]] %s3021_s21  ;;  %p2992_p2 = scmp.lt.s32.totalorder %s2289_s14, 4 }
  0x45   : > { %s308_s27 = sand.u32 1, %s2289_s14   ;;  %s310_s10 = sand.u32 1, %s2257_s29  }
  0x46   : > { %s1416_s28 = sshll.u32 %s310_s10, 6  ;;  %s1491_s16 = sshll.u32 %s2281_s12, 10 }
  0x47   : > { %s3024_s1 = sld [smem:[#allocation33_spill]]  ;;  %s312_s2 = scalar_lea.vmem [#allocation6], %s1416_s28 }
  0x48   : > { %s319_s23 = sshll.u32 %s312_s2, 4  ;;  %p2511_p4 = pnand %p2992_p2, %p2472_p10  ;;  %s2515_s23 = int_to_ptr.vmem [resolvable:$true] %s319_s23 }
  0x49   : > { %s2292_s10 = smov [#allocation11]  }
  0x4a   : > { %s2517_s20 = sshll.u32 %s2292_s10, 4  ;;  %p1953_p6 = pneg %p2511_p4  ;;  %s262_s20 = int_to_ptr.vmem [resolvable:$true] %s2517_s20 }
  0x4d   : > { %s2505_s11 = scalar_lea.hbm %s3024_s1, %s1491_s16  ;;  %s2519_s16 = scalar_lea.sflag [#allocation7], %s308_s27 }
  0x4e   : > { %s1951_s22 = scalar_lea.hbm %s2505_s11, 1024  ;;  %s1956_s18 = scalar_lea.hbm %s3024_s1, 2048 }
  0x4f   : > { %p1952_p1 = scmp.ne.s32.totalorder %s2505_s11, %s1951_s22  ;;  %p1957_p10 = scmp.lt.u32.totalorder %s2505_s11, %s3024_s1 }
  0x50   : > { %p1958_p11 = scmp.lt.u32.totalorder %s1956_s18, %s1951_s22  ;;  %p1960_p2 = scmp.lt.u32.totalorder %s1951_s22, %s2505_s11 }
  0x51   : > { %p1954_p8 = pnand %p1953_p6, %p1952_p1 }
  0x52   : > { %p1959_p12 = por %p1958_p11, %p1957_p10 }
  0x53   : > { %p1955_p9 = pneg %p1954_p8 }
  0x54   : > { %p1961_p3 = por %p1960_p2, %p1959_p12 }
  0x56   : > { %p1962_p13 = pnand %p1961_p3, %p1955_p9 }
  0x58   : > { %1965 = shalt.err (!%p1962_p13)
}
  0x59   : > { %s1966_s27 = scalar_lea.vmem %s2515_s23, 1024  ;;  %s2293_s10 = smov [#allocation6]  }
  0x5a   : > { %p1967_p1 = scmp.ne.s32.totalorder %s2515_s23, %s1966_s27  ;;  %s1971_s2 = sshll.u32 %s2293_s10, 4  ;;  %s1972_s2 = int_to_ptr.vmem [resolvable:$false] %s1971_s2 }
  0x5b   : > { %s1973_s29 = scalar_lea.vmem %s1972_s2, 2048  ;;  %p1974_p5 = scmp.lt.s32.totalorder %s2515_s23, %s1972_s2 }
  0x5c   : > { %p1969_p8 = pnand %p1967_p1, %p1953_p6  ;;  %p1975_p10 = scmp.lt.s32.totalorder %s1973_s29, %s1966_s27 }
  0x5e   : > { %p1970_p0 = pneg %p1969_p8  ;;  %p1976_p11 = por %p1975_p10, %p1974_p5 }
  0x60   : > { %p1977_p2 = pnand %p1976_p11, %p1970_p0 }
  0x62   : > { %1980 = shalt.err (!%p1977_p2)
}
  0x63   : > { %s2997_s21 = smov 64   ;;  %s2295_s22 = smov 4  }
  0x64   : > { %1765 = dma.hbm_to_vmem [thread:$0]  (!%p2511_p4), %s2505_s11, 1024, %s2515_s23, %s2519_s16, %s2997_s21, %s2997_s21, %s2295_s22  }
  0x65   : > { %s1981_s27 = scalar_lea.hbm %s2976_s4, 16 }
  0x66   : > { %p1982_p5 = scmp.ne.s32.totalorder %s2976_s4, %s1981_s27  ;;  %p1988_p0 = scmp.lt.u32.totalorder %s1981_s27, %s2976_s4 }
  0x68   : > { %p1984_p3 = pnand %p1982_p5, %p2443_p7 }
  0x6a   : > { %p1985_p13 = pneg %p1984_p3 }
  0x6c   : > { %p1990_p6 = pnand %p1988_p0, %p1985_p13 }
  0x6e   : > { %1993 = shalt.err (!%p1990_p6)
}
  0x6f   : > { %s1994_s3 = scalar_lea.vmem %s262_s20, 16  ;;  %s2001_s11 = scalar_lea.vmem %s262_s20, 32 }
  0x70   : > { %p1995_p4 = scmp.ne.s32.totalorder %s262_s20, %s1994_s3  ;;  %p2002_p1 = scmp.lt.s32.totalorder %s262_s20, %s262_s20 }
  0x71   : > { %p2003_p8 = scmp.lt.s32.totalorder %s2001_s11, %s1994_s3 }
  0x72   : > { %p1997_p9 = pnand %p1995_p4, %p2443_p7 }
  0x73   : > { %p2004_p10 = por %p2003_p8, %p2002_p1 }
  0x74   : > { %p1998_p12 = pneg %p1997_p9 }
  0x76   : > { %p2005_p11 = pnand %p2004_p10, %p1998_p12 }
  0x78   : > { %2008 = shalt.err (!%p2005_p11)
}
  0x79   : > { %p3026_p2 = scmp.ne.s32.totalorder %s3013_s19, 0  ;;  %s2296_s1 = smov [#allocation12]  }
  0x7a   : > { %s271_s18 = sshll.u32 %s2296_s1, 4  ;;  %s2009_s2 = scalar_lea.hbm %s2977_s5, 1024  ;;  %s272_s18 = int_to_ptr.vmem [resolvable:$true] %s271_s18 }
  0x7b   : > { %1755 = dma.hbm_to_vmem [thread:$0]  (!%p3026_p2), %s2976_s4, 16, %s262_s20, [#allocation10]  }
  0x7c   : > { %p2010_p5 = scmp.ne.s32.totalorder %s2977_s5, %s2009_s2  ;;  %p2016_p0 = scmp.lt.u32.totalorder %s2009_s2, %s2977_s5 }
  0x7e   : > { %p2012_p3 = pnand %p2010_p5, %p2443_p7 }
  0x80   : > { %p2013_p13 = pneg %p2012_p3 }
  0x82   : > { %p2018_p6 = pnand %p2016_p0, %p2013_p13 }
  0x84   : > { %2021 = shalt.err (!%p2018_p6)
}
  0x85   : > { %s2022_s20 = scalar_lea.vmem %s272_s18, 1024  ;;  %p2030_p1 = scmp.lt.s32.totalorder %s272_s18, %s272_s18 }
  0x86   : > { %p2023_p4 = scmp.ne.s32.totalorder %s272_s18, %s2022_s20  ;;  %p2031_p8 = scmp.lt.s32.totalorder %s2022_s20, %s2022_s20 }
  0x88   : > { %p2025_p9 = pnand %p2023_p4, %p2443_p7  ;;  %p2032_p10 = por %p2031_p8, %p2030_p1 }
  0x8a   : > { %p2026_p12 = pneg %p2025_p9 }
  0x8c   : > { %p2033_p11 = pnand %p2032_p10, %p2026_p12 }
  0x8e   : > { %2036 = shalt.err (!%p2033_p11)
}
  0x8f   : > { %s3027_s21 = smov 64   ;;  %s51_s19 = sadd.s32 1, %s2269_s9 }
  0x90   : > { %1758 = dma.hbm_to_vmem [thread:$0]  (!%p3026_p2), %s2977_s5, 1024, %s272_s18, [#allocation13], %s3027_s21, %s3027_s21, %s2295_s22  }
  0x91   : > { %p58_p7 = scmp.ne.s32.totalorder %s2269_s9, %s2265_s8  ;;  %p3028_p5 = scmp.ne.s32.totalorder %s3023_s6, 0 }
  0x92   : > { %p3029_p3 = scmp.eq.s32.totalorder %s2289_s14, 0  ;;  %p64_p0 = scmp.ne.s32.totalorder %s2265_s8, %s2261_s30 }
  0x93   : > { %s2596_s17 = scalar_select %p3028_p5, %s2269_s9, %s51_s19  }
  0x94   : > { %p60_p13 = por %p3029_p3, %p58_p7  ;;  %s285_s1 = sand.u32 1, %s2269_s9  }
  0x95   : > { %s1490_s27 = sshll.u32 %s2285_s13, 5  ;;  %p3030_p6 = scmp.eq.s32.totalorder %s2418_s15, 0 }
  0x96   : > { %s1412_s2 = sshll.u32 %s285_s1, 6  ;;  %s295_s29 = sadd.s32 %s2281_s12, %s1490_s27 }
  0x97   : > { %p2606_p4 = por %p3030_p6, %p64_p0  ;;  %s1415_s3 = sshll.u32 %s295_s29, 6 }
  0x98   : > { %s2614_s20 = scalar_lea.hbm %s2972_s0, %s1415_s3  ;;  %s289_s30 = scalar_lea.vmem [#allocation3], %s1412_s2 }
  0x99   : > { %s298_s6 = sshll.u32 %s289_s30, 4  ;;  %p3032_p2 = scmp.lt.s32.totalorder %s2289_s14, 4  ;;  %s2616_s6 = int_to_ptr.vmem [resolvable:$true] %s298_s6 }
  0x9a   : > { %s2624_s28 = scalar_lea.sflag [#allocation4], %s285_s1  ;;  %s2037_s19 = scalar_lea.hbm %s2614_s20, 1024 }
  0x9b   : > { %p2620_p9 = pnand %p3032_p2, %p60_p13  ;;  %p2038_p12 = scmp.ne.s32.totalorder %s2614_s20, %s2037_s19 }
  0x9c   : > { %s2042_s29 = scalar_lea.hbm %s2972_s0, 4096  ;;  %p2043_p11 = scmp.lt.u32.totalorder %s2614_s20, %s2972_s0 }
  0x9d   : > { %p2039_p1 = pneg %p2620_p9  ;;  %p2044_p7 = scmp.lt.u32.totalorder %s2042_s29, %s2037_s19 }
  0x9e   : > { %p2046_p3 = scmp.lt.u32.totalorder %s2037_s19, %s2614_s20 }
  0x9f   : > { %p2040_p8 = pnand %p2039_p1, %p2038_p12  ;;  %p2045_p5 = por %p2044_p7, %p2043_p11 }
  0xa1   : > { %p2041_p10 = pneg %p2040_p8  ;;  %p2047_p13 = por %p2046_p3, %p2045_p5 }
  0xa3   : > { %p2048_p0 = pnand %p2047_p13, %p2041_p10 }
  0xa5   : > { %2051 = shalt.err (!%p2048_p0)
}
  0xa6   : > { %s2052_s1 = scalar_lea.vmem %s2616_s6, 1024  ;;  %s2297_s11 = smov [#allocation3]  }
  0xa7   : > { %p2053_p6 = scmp.ne.s32.totalorder %s2616_s6, %s2052_s1  ;;  %s2057_s30 = sshll.u32 %s2297_s11, 4  ;;  %s2058_s30 = int_to_ptr.vmem [resolvable:$false] %s2057_s30 }
  0xa8   : > { %s2059_s27 = scalar_lea.vmem %s2058_s30, 2048  ;;  %p2060_p8 = scmp.lt.s32.totalorder %s2616_s6, %s2058_s30 }
  0xa9   : > { %p2055_p2 = pnand %p2053_p6, %p2039_p1  ;;  %p2061_p11 = scmp.lt.s32.totalorder %s2059_s27, %s2052_s1 }
  0xab   : > { %p2056_p12 = pneg %p2055_p2  ;;  %p2062_p7 = por %p2061_p11, %p2060_p8 }
  0xad   : > { %p2063_p5 = pnand %p2062_p7, %p2056_p12 }
  0xaf   : > { %2066 = shalt.err (!%p2063_p5)
}
  0xb0   : > { %s2298_s19 = smov 128   ;;  %s1406_s23 = sadd.s32 4294967294, %s2289_s14  }
  0xb1   : > { %1762 = dma.hbm_to_vmem [thread:$0]  (!%p2620_p9), %s2614_s20, 1024, %s2616_s6, %s2624_s28, %s2298_s19, %s3027_s21, %s2295_s22  }
  0xb2   : > { %p101_p1 = scmp.eq.s32.totalorder %s2485_s7, 0  ;;  %s103_s2 = sadd.s32 1, %s2245_s26 }
  0xb3   : > { %p110_p10 = scmp.ne.s32.totalorder %s2245_s26, %s2241_s25  ;;  %p3034_p3 = scmp.eq.s32.totalorder %s2289_s14, 0 }
  0xb4   : > { %s2660_s29 = scalar_select %p101_p1, %s2245_s26, %s103_s2  }
  0xb5   : > { %p2664_p13 = por %p110_p10, %p3034_p3  ;;  %p116_p0 = scmp.ne.s32.totalorder %s2241_s25, %s2237_s24 }
  0xb6   : > { %p2999_p6 = scmp.eq.s32.totalorder %s2418_s15, 3  ;;  %p209_p2 = scmp.eq.s32.totalorder %s1406_s23, 3 }
  0xb7   : > { %p3036_p12 = scmp.eq.s32.totalorder %s2418_s15, 0  ;;  %s331_s7 = sand.u32 1, %s2245_s26  }
  0xb8   : > { %p2680_p9 = por %p2999_p6, %p110_p10  ;;  %p2684_p11 = por %p209_p2, %p116_p0 }
  0xb9   : > { %p2673_p8 = por %p116_p0, %p3036_p12  ;;  %s1419_s20 = sshll.u32 %s2285_s13, 4 }
  0xba   : > { %s3038_s22 = scalar_select %p2680_p9, 1, 0 }
  0xbb   : > { %s3037_s18 = scalar_select %p2673_p8, 1, 0 }
  0xbc   : > { %s3039_s21 = scalar_select %p2684_p11, 1, 0 }
  0xbd   : > { %s3040_s1 = sld [smem:[#allocation34_spill]]  ;;  %s332_s30 = scalar_lea.vmem [#allocation8], %s331_s7 }
  0xbe   : > { %s339_s27 = sshll.u32 %s332_s30, 4  ;;  %p3041_p7 = scmp.lt.s32.totalorder %s2289_s14, 4  ;;  %s2694_s27 = int_to_ptr.vmem [resolvable:$true] %s339_s27 }
  0xc0   : > { %p2700_p5 = pnand %p3041_p7, %p2664_p13 }
  0xc2   : > { %p2069_p10 = pneg %p2700_p5 }
  0xc3   : > { %s2692_s11 = scalar_lea.hbm %s3040_s1, %s1419_s20  ;;  %s2072_s20 = scalar_lea.hbm %s3040_s1, 32 }
  0xc4   : > { %s2067_s23 = scalar_lea.hbm %s2692_s11, 16  ;;  %p2073_p13 = scmp.lt.u32.totalorder %s2692_s11, %s3040_s1 }
  0xc5   : > { %p2068_p1 = scmp.ne.s32.totalorder %s2692_s11, %s2067_s23  ;;  %p2074_p2 = scmp.lt.u32.totalorder %s2072_s20, %s2067_s23 }
  0xc6   : > { %p2076_p7 = scmp.lt.u32.totalorder %s2067_s23, %s2692_s11 }
  0xc7   : > { %p2070_p3 = pnand %p2069_p10, %p2068_p1  ;;  %p2075_p12 = por %p2074_p2, %p2073_p13 }
  0xc9   : > { %p2071_p0 = pneg %p2070_p3  ;;  %p2077_p6 = por %p2076_p7, %p2075_p12 }
  0xcb   : > { %p2078_p11 = pnand %p2077_p6, %p2071_p0 }
  0xcd   : > { %2081 = shalt.err (!%p2078_p11)
}
  0xce   : > { %s2082_s28 = scalar_lea.vmem %s2694_s27, 16  ;;  %s2299_s30 = smov [#allocation8]  }
  0xcf   : > { %p2083_p1 = scmp.ne.s32.totalorder %s2694_s27, %s2082_s28  ;;  %s2087_s2 = sshll.u32 %s2299_s30, 4  ;;  %s2088_s2 = int_to_ptr.vmem [resolvable:$false] %s2087_s2 }
  0xd0   : > { %s2089_s7 = scalar_lea.vmem %s2088_s2, 32  ;;  %p2090_p8 = scmp.lt.s32.totalorder %s2694_s27, %s2088_s2 }
  0xd1   : > { %p2085_p3 = pnand %p2083_p1, %p2069_p10  ;;  %p2091_p13 = scmp.lt.s32.totalorder %s2089_s7, %s2082_s28 }
  0xd3   : > { %p2086_p9 = pneg %p2085_p3  ;;  %p2092_p2 = por %p2091_p13, %p2090_p8 }
  0xd5   : > { %p2093_p12 = pnand %p2092_p2, %p2086_p9 }
  0xd7   : > { %2096 = shalt.err (!%p2093_p12)
}
  0xd8   : > { %1768 = dma.hbm_to_vmem [thread:$0]  (!%p2700_p5), %s2692_s11, 16, %s2694_s27, %s2519_s16  }
  0xd9   : > { %s3043_s23 = sld [smem:[#allocation28_spill]] }
  0xdf   : > { %p3044_p6 = scmp.ne.s32.totalorder %s3043_s23, 0 }
  0xe0   : > { %s350_s20 = sand.u32 (!%p3044_p6), 1, %s2265_s8  }
  0xe1   : > { %348 = sbr.rel (%p3044_p6) target bundleno = 1096 (0x448), region = 44  ;;  %s1421_s3 = sshll.u32 (!%p3044_p6), %s350_s20, 6 }
  0xe2   : > { %s351_s6 = scalar_lea.sflag (!%p3044_p6), [#allocation4], %s350_s20  ;;  %s2733_s30 = scalar_lea.vmem (!%p3044_p6), [#allocation3], %s1421_s3 }
  0xe8   : > { %2208 = dma.done.wait (%p2606_p4), %s351_s6, 1024  }
  0xe9   : > { %2210 = vsyncadd (%p2606_p4), %s351_s6, 4294966272  ;;  %s3045_s19 = sld [smem:[#allocation24_spill]]  ;;  %s359_s2 = sand.u32 1, %s2418_s15  }
  0xea   : > { %s3046_s28 = sld [smem:[#allocation32_spill]]  ;;  %s360_s27 = scalar_lea.sflag [#allocation7], %s359_s2 }
  0xef   : > { %s361_s16 = sand.u32 1, %s3045_s19  }
  0xf0   : > { %s1422_s11 = sshll.u32 %s361_s16, 6  ;;  %p3047_p8 = scmp.ne.s32.totalorder %s3046_s28, 0 }
  0xf1   : > { %s2741_s7 = scalar_lea.vmem [#allocation6], %s1422_s11 }
  0xf2   : > { %2212 = dma.done.wait (%p3047_p8), %s360_s27, 1024  }
  0xf3   : > { %2214 = vsyncadd (%p3047_p8), %s360_s27, 4294966272  ;;  %s2748_s23 = sand.u32 1, %s2241_s25   ;;  %p3048_p4 = scmp.ne.s32.totalorder %s3037_s18, 0 }
  0xf4   : > { %s371_s10 = scalar_lea.vmem [#allocation8], %s2748_s23 }
  0xf5   : > { %2216 = dma.done.wait (%p3048_p4), %s360_s27, 16  }
  0xf6   : > { %2218 = vsyncadd (%p3048_p4), %s360_s27, 4294967280  ;;  %p3049_p9 = scmp.eq.s32.totalorder %s2418_s15, 0 }
  0xf8   : > { %2220 = dma.done.wait (%p3049_p9), [#allocation10], 80   ;;  %p3050_p11 = pmov %p3049_p9 }
  0xf9   : > { %p3051_p5 = pmov %p3049_p9 }
  0xfa   : > { %2222 = vsyncadd (%p3050_p11), [#allocation10], 4294967216 }
  0xfb   : > { %2224 = dma.done.wait (%p3051_p5), [#allocation13], 1024   ;;  %p3052_p10 = pmov %p3051_p5 }
  0xfc   : > { %s1426_s18 = sshll.u32 %s2748_s23, 6  ;;  %v427_v0 = vld [vmem:[%s2733_s30] sm:$0xf]  ;;  %v428_v1 = vld [vmem:[%s2733_s30 + $0x4] sm:$0xf]  ;;  %s3053_s3 = sld [smem:[#allocation26_spill]] }
  0xfd   : > { %2226 = vsyncadd (%p3052_p10), [#allocation13], 4294966272  ;;  %v429_v2 = vld [vmem:[%s2733_s30 + $0x8] sm:$0xf]  ;;  %v430_v3 = vld [vmem:[%s2733_s30 + $0xc] sm:$0xf] }
  0xfe   : > { %v431_v4 = vld [vmem:[%s2733_s30 + $0x10] sm:$0xf]  ;;  %v432_v5 = vld [vmem:[%s2733_s30 + $0x14] sm:$0xf]  ;;  %v433_v6 = vld [vmem:[%s2733_s30 + $0x18] sm:$0xf] }
  0xff   : > { %v434_v7 = vld [vmem:[%s2733_s30 + $0x1c] sm:$0xf]  ;;  %v435_v8 = vld [vmem:[%s2733_s30 + $0x20] sm:$0xf]  ;;  %v436_v9 = vld [vmem:[%s2733_s30 + $0x24] sm:$0xf] }
 0x100   : > { %v437_v10 = vld [vmem:[%s2733_s30 + $0x28] sm:$0xf]  ;;  %v438_v11 = vld [vmem:[%s2733_s30 + $0x2c] sm:$0xf]  ;;  %v2777_v12 = vld [vmem:[%s2733_s30 + $0x30] sm:$0xf] }
 0x101   : > { %v2780_v13 = vld [vmem:[%s2733_s30 + $0x34] sm:$0xf]  ;;  %v2783_v14 = vld [vmem:[%s2733_s30 + $0x38] sm:$0xf]  ;;  %v2786_v15 = vld [vmem:[%s2733_s30 + $0x3c] sm:$0xf] }
 0x102   : > { %s2788_s20 = scalar_lea.vmem [#allocation14], %s1426_s18  ;;  %p1427_p0 = scmp.ne.s32.totalorder %s3053_s3, 0 }
 0x103   : > { %vm447_vm0 = vcmask (!%p1427_p0), 64512   ;;  %v2300_v16 = vmov (!%p1427_p0), 0.0  }
 0x104   : > { %446 = sbr.rel (%p1427_p0) target bundleno = 268 (0x10c), region = 72  ;;  %448 = vst.msk [vmem:[#allocation2] sm:$0xff] (!%p1427_p0), %vm447_vm0, %v2300_v16  ;;  %449 = vst.msk [vmem:[#allocation2 + $0x8] sm:$0xff] (!%p1427_p0), %vm447_vm0, %v2300_v16 }
 0x105   : > { %450 = vst.msk [vmem:[#allocation2 + $0x10] sm:$0xff] (!%p1427_p0), %vm447_vm0, %v2300_v16  ;;  %451 = vst.msk [vmem:[#allocation2 + $0x18] sm:$0xff] (!%p1427_p0), %vm447_vm0, %v2300_v16 }
 0x106   : > { %452 = vst.msk [vmem:[#allocation2 + $0x20] sm:$0xff] (!%p1427_p0), %vm447_vm0, %v2300_v16  ;;  %453 = vst.msk [vmem:[#allocation2 + $0x28] sm:$0xff] (!%p1427_p0), %vm447_vm0, %v2300_v16 }
 0x107   : > { %454 = vst.msk [vmem:[#allocation2 + $0x30] sm:$0xff] (!%p1427_p0), %vm447_vm0, %v2300_v16  ;;  %455 = vst.msk [vmem:[#allocation2 + $0x38] sm:$0xff] (!%p1427_p0), %vm447_vm0, %v2300_v16 }
 0x108   : > { %456 = vst.msk [vmem:[#allocation2 + $0x40] sm:$0xff] (!%p1427_p0), %vm447_vm0, %v2300_v16  ;;  %457 = vst.msk [vmem:[#allocation2 + $0x48] sm:$0xff] (!%p1427_p0), %vm447_vm0, %v2300_v16 }
 0x109   : > { %458 = vst.msk [vmem:[#allocation2 + $0x50] sm:$0xff] (!%p1427_p0), %vm447_vm0, %v2300_v16  ;;  %459 = vst.msk [vmem:[#allocation2 + $0x58] sm:$0xff] (!%p1427_p0), %vm447_vm0, %v2300_v16 }
 0x10a   : > { %460 = vst.msk [vmem:[#allocation2 + $0x60] sm:$0xff] (!%p1427_p0), %vm447_vm0, %v2300_v16  ;;  %461 = vst.msk [vmem:[#allocation2 + $0x68] sm:$0xff] (!%p1427_p0), %vm447_vm0, %v2300_v16 }
 0x10b   : > { %462 = vst.msk [vmem:[#allocation2 + $0x70] sm:$0xff] %vm447_vm0, %v2300_v16  ;;  %463 = vst.msk [vmem:[#allocation2 + $0x78] sm:$0xff] %vm447_vm0, %v2300_v16 }
 0x10c PF: > { %v1907_v17 = vld [vmem:[%s2741_s7] sm:$0xff]   ;;  %v1428_v18 = vcombine.low %v427_v0, %v428_v1  ;;  %v1908_v19 = vld [vmem:[%s2741_s7 + $0x8] sm:$0xff]   ;;  %v2301_v20 = vmov 0.0   ;;  %v1429_v21 = vcombine.low %v429_v2, %v430_v3  ;;  %v1909_v22 = vld [vmem:[%s2741_s7 + $0x10] sm:$0xff]   ;;  %vm2302_vm1 = vmmov 0   ;;  %s3054_s6 = sld [smem:[#allocation26_spill]] }
 0x10d   : > { %1638 = vmatprep.subr.bf16.mxu1 %v2301_v20  ;;  %1606 = vmatprep.subr.bf16.mxu0 %v1907_v17  ;;  %v1430_v23 = vcombine.low %v431_v4, %v432_v5  ;;  %v1910_v24 = vld [vmem:[%s2741_s7 + $0x18] sm:$0xff]   ;;  %v1431_v25 = vcombine.low %v433_v6, %v434_v7  ;;  %v1911_v26 = vld [vmem:[%s2741_s7 + $0x20] sm:$0xff]   ;;  %v1432_v27 = vcombine.low %v435_v8, %v436_v9  ;;  %v1912_v28 = vld [vmem:[%s2741_s7 + $0x28] sm:$0xff]   ;;  %vm705_vm2 = vcmask 64512   ;;  %s3055_s19 = sld [smem:[#allocation27_spill]] }
 0x10e   : > { %1639 = vmatpush3.bf16.msra.mxu1 %v1428_v18  ;;  %1607 = vmatpush3.bf16.msra.mxu0 %v1907_v17  ;;  %v1433_v29 = vcombine.low %v437_v10, %v438_v11  ;;  %v1913_v30 = vld [vmem:[%s2741_s7 + $0x30] sm:$0xff]   ;;  %v1434_v31 = vcombine.low %v2777_v12, %v2780_v13  ;;  %v1914_v32 = vld [vmem:[%s2741_s7 + $0x38] sm:$0xff]   ;;  %v1435_v33 = vcombine.low %v2783_v14, %v2786_v15  ;;  %v722_v34 = vld [vmem:[%s371_s10] sm:$0x1] }
 0x10f   : > { %1640 = vmatprep.subr.bf16.mxu1 %v2301_v20  ;;  %1608 = vmatprep.subr.bf16.mxu0 %v1908_v19  ;;  %v466_v35 = vld [vmem:[#allocation2 + $0x10] sm:$0xff]  ;;  %v464_v36 = vld [vmem:[#allocation2] sm:$0xff]  ;;  %v467_v39 = vld [vmem:[#allocation2 + $0x18] sm:$0xff] }
 0x110   : > { %1622 = vmatprep.mubr.bf16.mxu0 %v1428_v18  ;;  %1654 = vmatprep.mubr.msk.bf16.mxu1 %vm2302_vm1, %v2301_v20  ;;  %v465_v43 = vld [vmem:[#allocation2 + $0x8] sm:$0xff]  ;;  %v470_v51 = vld [vmem:[#allocation2 + $0x30] sm:$0xff]  ;;  %v468_v52 = vld [vmem:[#allocation2 + $0x20] sm:$0xff] }
 0x111   : > { %v471_v54 = vld [vmem:[#allocation2 + $0x38] sm:$0xff]  ;;  %v469_v57 = vld [vmem:[#allocation2 + $0x28] sm:$0xff]  ;;  %v474_v63 = vld [vmem:[#allocation2 + $0x50] sm:$0xff] }
 0x112   : > { %1641 = vmatpush3.bf16.msra.mxu1 %v1429_v21  ;;  %1609 = vmatpush3.bf16.msra.mxu0 %v1908_v19  ;;  %s1444_s30 = sshll.u32 %s3054_s6, 7  ;;  %v472_v0 = vld [vmem:[#allocation2 + $0x40] sm:$0xff]  ;;  %v475_v2 = vld [vmem:[#allocation2 + $0x58] sm:$0xff]  ;;  %v473_v5 = vld [vmem:[#allocation2 + $0x48] sm:$0xff] }
 0x113   : > { %1642 = vmatprep.subr.bf16.mxu1 %v2301_v20  ;;  %1610 = vmatprep.subr.bf16.mxu0 %v1909_v22  ;;  %v478_v11 = vld [vmem:[#allocation2 + $0x70] sm:$0xff]  ;;  %v476_v12 = vld [vmem:[#allocation2 + $0x60] sm:$0xff]  ;;  %v479_v14 = vld [vmem:[#allocation2 + $0x78] sm:$0xff]  ;;  %p1445_p7 = scmp.ne.s32.totalorder %s3055_s19, 0 }
 0x114   : > { %v477_v17 = vld [vmem:[#allocation2 + $0x68] sm:$0xff]  ;;  %s768_s2 = sshra.s32 (!%p1445_p7), %s1444_s30, 7 }
 0x115   : > { %s1446_s16 = sshll.u32 (!%p1445_p7), %s768_s2, 1 }
 0x116   : > { %1643 = vmatpush3.bf16.msra.mxu1 %v1430_v23  ;;  %1611 = vmatpush3.bf16.msra.mxu0 %v1909_v22  ;;  %s771_s11 = scalar_lea.vmem (!%p1445_p7), [#allocation15], %s1446_s16 }
 0x117   : > { %1644 = vmatprep.subr.bf16.mxu1 %v2301_v20  ;;  %1612 = vmatprep.subr.bf16.mxu0 %v1910_v24 }
 0x11a   : > { %1645 = vmatpush3.bf16.msra.mxu1 %v1431_v25  ;;  %1613 = vmatpush3.bf16.msra.mxu0 %v1910_v24 }
 0x11b   : > { %1646 = vmatprep.subr.bf16.mxu1 %v2301_v20  ;;  %1614 = vmatprep.subr.bf16.mxu0 %v1911_v26 }
 0x11e   : > { %1647 = vmatpush3.bf16.msra.mxu1 %v1432_v27  ;;  %1615 = vmatpush3.bf16.msra.mxu0 %v1911_v26 }
 0x11f   : > { %1648 = vmatprep.subr.bf16.mxu1 %v2301_v20  ;;  %1616 = vmatprep.subr.bf16.mxu0 %v1912_v28 }
 0x122   : > { %1649 = vmatpush3.bf16.msra.mxu1 %v1433_v29  ;;  %1617 = vmatpush3.bf16.msra.mxu0 %v1912_v28 }
 0x123   : > { %1650 = vmatprep.subr.bf16.mxu1 %v2301_v20  ;;  %1618 = vmatprep.subr.bf16.mxu0 %v1913_v30 }
 0x126   : > { %1651 = vmatpush3.bf16.msra.mxu1 %v1434_v31  ;;  %1619 = vmatpush3.bf16.msra.mxu0 %v1913_v30 }
 0x127   : > { %1652 = vmatprep.subr.bf16.mxu1 %v2301_v20  ;;  %1620 = vmatprep.subr.bf16.mxu0 %v1914_v32 }
 0x12a   : > { %1653 = vmatpush3.bf16.msra.mxu1 %v1435_v33  ;;  %1621 = vmatpush3.bf16.msra.mxu0 %v1914_v32 }
 0x12d   : > { %1655 = vmatmul.mubr.bf16.vlgmr.msra.gmra.mrb[0].mxu1 %v722_v34  ;;  %1623 = vmatmul.mubr.bf16.vlgmr.msra.gmra.mrb[0].mxu0 %v1429_v21 }
 0x12e   : > { %1626 = vmatprep.mubr.bf16.mxu0 %v1430_v23 }
 0x135   : > { %1627 = vmatmul.mubr.bf16.gmra.mrb[4].mxu0 %v1431_v25 }
 0x136   : > { %1630 = vmatprep.mubr.bf16.mxu0 %v1432_v27 }
 0x13d   : > { %1631 = vmatmul.mubr.bf16.gmra.mrb[8].mxu0 %v1433_v29 }
 0x13e   : > { %1634 = vmatprep.mubr.bf16.mxu0 %v1434_v31 }
 0x145   : > { %1635 = vmatmul.mubr.bf16.gmra.mrb[12].mxu0 %v1435_v33 }
 0x200   : > { %v2822_v37 = vpop.f32.mrb[0].mxu1  ;;  %v1624_v38 = vpop.f32.mrb[0].mxu0 }
 0x201   : > { %v1656_v40 = vpop.f32.mrb[1].mxu1  ;;  %v691_v41 = vadd.f32 %v1624_v38, %v466_v35  ;;  %v626_v42 = vpop.f32.mrb[1].mxu0  ;;  %772 = vst [vmem:[%s771_s11] sm:$0x3] (!%p1445_p7), %v2822_v37 }
 0x202   : > { %v760_v44 = vpop.f32.mrb[2].mxu1  ;;  %v689_v45 = vadd.f32 %v626_v42, %v464_v36  ;;  %v1625_v46 = vpop.f32.mrb[2].mxu0 }
 0x203   : > { %v1657_v47 = vpop.f32.mrb[3].mxu1  ;;  %708 = vst.msk [vmem:[#allocation2 + $0x10] sm:$0xff] %vm705_vm2, %v691_v41  ;;  %v692_v48 = vadd.f32 %v1625_v46, %v467_v39  ;;  %v629_v49 = vpop.f32.mrb[3].mxu0 }
 0x204   : > { %706 = vst.msk [vmem:[#allocation2] sm:$0xff] %vm705_vm2, %v689_v45  ;;  %v690_v50 = vadd.f32 %v629_v49, %v465_v43 }
 0x205   : > { %709 = vst.msk [vmem:[#allocation2 + $0x18] sm:$0xff] %vm705_vm2, %v692_v48 }
 0x206   : > { %707 = vst.msk [vmem:[#allocation2 + $0x8] sm:$0xff] %vm705_vm2, %v690_v50 }
 0x208   : > { %v1628_v53 = vpop.f32.mrb[4].mxu0 }
 0x209   : > { %v695_v55 = vadd.f32 %v1628_v53, %v470_v51  ;;  %v642_v56 = vpop.f32.mrb[5].mxu0 }
 0x20a   : > { %v693_v58 = vadd.f32 %v642_v56, %v468_v52  ;;  %v1629_v59 = vpop.f32.mrb[6].mxu0 }
 0x20b   : > { %712 = vst.msk [vmem:[#allocation2 + $0x30] sm:$0xff] %vm705_vm2, %v695_v55  ;;  %v696_v60 = vadd.f32 %v1629_v59, %v471_v54  ;;  %v645_v61 = vpop.f32.mrb[7].mxu0 }
 0x20c   : > { %710 = vst.msk [vmem:[#allocation2 + $0x20] sm:$0xff] %vm705_vm2, %v693_v58  ;;  %v694_v62 = vadd.f32 %v645_v61, %v469_v57 }
 0x20d   : > { %713 = vst.msk [vmem:[#allocation2 + $0x38] sm:$0xff] %vm705_vm2, %v696_v60 }
 0x20e   : > { %711 = vst.msk [vmem:[#allocation2 + $0x28] sm:$0xff] %vm705_vm2, %v694_v62 }
 0x210   : > { %v1632_v1 = vpop.f32.mrb[8].mxu0 }
 0x211   : > { %v699_v3 = vadd.f32 %v1632_v1, %v474_v63  ;;  %v658_v4 = vpop.f32.mrb[9].mxu0 }
 0x212   : > { %v697_v6 = vadd.f32 %v658_v4, %v472_v0  ;;  %v1633_v7 = vpop.f32.mrb[10].mxu0 }
 0x213   : > { %716 = vst.msk [vmem:[#allocation2 + $0x50] sm:$0xff] %vm705_vm2, %v699_v3  ;;  %v700_v8 = vadd.f32 %v1633_v7, %v475_v2  ;;  %v661_v9 = vpop.f32.mrb[11].mxu0 }
 0x214   : > { %714 = vst.msk [vmem:[#allocation2 + $0x40] sm:$0xff] %vm705_vm2, %v697_v6  ;;  %v698_v10 = vadd.f32 %v661_v9, %v473_v5 }
 0x215   : > { %717 = vst.msk [vmem:[#allocation2 + $0x58] sm:$0xff] %vm705_vm2, %v700_v8 }
 0x216   : > { %715 = vst.msk [vmem:[#allocation2 + $0x48] sm:$0xff] %vm705_vm2, %v698_v10 }
 0x218   : > { %v1636_v13 = vpop.f32.mrb[12].mxu0  ;;  %767 = sbr.rel (%p1445_p7) target bundleno = 543 (0x21f), region = 76 }
 0x219   : > { %v703_v15 = vadd.f32 %v1636_v13, %v478_v11  ;;  %v674_v16 = vpop.f32.mrb[13].mxu0 }
 0x21a   : > { %v701_v18 = vadd.f32 %v674_v16, %v476_v12  ;;  %v1637_v19 = vpop.f32.mrb[14].mxu0 }
 0x21b   : > { %720 = vst.msk [vmem:[#allocation2 + $0x70] sm:$0xff] %vm705_vm2, %v703_v15  ;;  %v704_v20 = vadd.f32 %v1637_v19, %v479_v14  ;;  %v677_v21 = vpop.f32.mrb[15].mxu0 }
 0x21c   : > { %718 = vst.msk [vmem:[#allocation2 + $0x60] sm:$0xff] %vm705_vm2, %v701_v18  ;;  %v702_v22 = vadd.f32 %v677_v21, %v477_v17 }
 0x21d   : > { %721 = vst.msk [vmem:[#allocation2 + $0x78] sm:$0xff] %vm705_vm2, %v704_v20 }
 0x21e   : > { %719 = vst.msk [vmem:[#allocation2 + $0x68] sm:$0xff] %vm705_vm2, %v702_v22 }
 0x21f PF: > { %s3057_s27 = sld [smem:[#allocation27_spill]] }
 0x225   : > { %p1447_p1 = scmp.le.s32.totalorder %s3057_s27, 0 }
 0x226   : > { %s777_s10 = sshra.s32 (!%p1447_p1), %s1444_s30, 7 }
 0x227   : > { %776 = sbr.rel (%p1447_p1) target bundleno = 558 (0x22e), region = 80  ;;  %s1448_s18 = sshll.u32 (!%p1447_p1), %s777_s10, 1 }
 0x228   : > { %s780_s3 = scalar_lea.vmem (!%p1447_p1), [#allocation15], %s1448_s18 }
 0x229   : > { %v781_v23 = vld [vmem:[%s780_s3] sm:$0x3] (!%p1447_p1) }
 0x22a   : > { %v782_v24 = vadd.f32 (!%p1447_p1), %v781_v23, %v2822_v37 }
 0x22c   : > { %783 = vst [vmem:[%s780_s3] sm:$0x3] (!%p1447_p1), %v782_v24 }
 0x22e PF: > { %s3059_s6 = sld [smem:[#allocation26_spill]] }
 0x234   : > { %p1449_p3 = scmp.ne.s32.totalorder %s3059_s6, 1 }
 0x235   : > { %v812_v25 = vld [vmem:[#allocation9] sm:$0xf] (!%p1449_p3)  ;;  %vm844_vm3 = vcmask (!%p1449_p3), 1043456   ;;  %v789_v27 = vld [vmem:[#allocation2 + $0x8] sm:$0xff] (!%p1449_p3)  ;;  %v790_v30 = vld [vmem:[#allocation2 + $0x10] sm:$0xff] (!%p1449_p3) }
 0x236   : > { %787 = sbr.rel (%p1449_p3) target bundleno = 1034 (0x40a), region = 84  ;;  %v788_v26 = vld [vmem:[#allocation2] sm:$0xff] (!%p1449_p3)  ;;  %1724 = vmatprep.subr.msk.bf16.mxu0 (!%p1449_p3), %vm844_vm3, %v812_v25  ;;  %v846_v28 = vsel (!%p1449_p3), %vm844_vm3, %v812_v25, 0  ;;  %v791_v31 = vld [vmem:[#allocation2 + $0x18] sm:$0xff] (!%p1449_p3)  ;;  %v793_v34 = vld [vmem:[#allocation2 + $0x28] sm:$0xff] (!%p1449_p3) }
 0x237   : > { %v804_v29 = vpack.c.bf16 (!%p1449_p3), %v789_v27, %v788_v26  ;;  %v792_v32 = vld [vmem:[#allocation2 + $0x20] sm:$0xff] (!%p1449_p3)  ;;  %1659 = vmatpush3.bf16.msra.mxu0 (!%p1449_p3), %v846_v28  ;;  %v805_v33 = vpack.c.bf16 (!%p1449_p3), %v791_v31, %v790_v30  ;;  %v794_v36 = vld [vmem:[#allocation2 + $0x30] sm:$0xff] (!%p1449_p3)  ;;  %v795_v37 = vld [vmem:[#allocation2 + $0x38] sm:$0xff] (!%p1449_p3) }
 0x238   : > { %v806_v35 = vpack.c.bf16 (!%p1449_p3), %v793_v34, %v792_v32  ;;  %v796_v38 = vld [vmem:[#allocation2 + $0x40] sm:$0xff] (!%p1449_p3)  ;;  %v797_v39 = vld [vmem:[#allocation2 + $0x48] sm:$0xff] (!%p1449_p3)  ;;  %v1916_v41 = vld [vmem:[#allocation12 + $0x8] sm:$0xff] (!%p1449_p3)   ;;  %v807_v42 = vpack.c.bf16 (!%p1449_p3), %v795_v37, %v794_v36 }
 0x239   : > { %1660 = vmatprep.mubr.msk.bf16.mxu0 (!%p1449_p3), %vm705_vm2, %v804_v29  ;;  %v1915_v40 = vld [vmem:[#allocation12] sm:$0xff] (!%p1449_p3)   ;;  %v808_v43 = vpack.c.bf16 (!%p1449_p3), %v797_v39, %v796_v38  ;;  %v1917_v44 = vld [vmem:[#allocation12 + $0x10] sm:$0xff] (!%p1449_p3)   ;;  %v798_v45 = vld [vmem:[#allocation2 + $0x50] sm:$0xff] (!%p1449_p3) }
 0x23a   : > { %1661 = vmatmul.mubr.msk.bf16.vlgmr.msra.gmra.mrb[0].mxu0 (!%p1449_p3), %vm705_vm2, %v805_v33  ;;  %1676 = vmatprep.subr.bf16.mxu0 (!%p1449_p3), %v1915_v40  ;;  %v799_v46 = vld [vmem:[#allocation2 + $0x58] sm:$0xff] (!%p1449_p3)  ;;  %v800_v47 = vld [vmem:[#allocation2 + $0x60] sm:$0xff] (!%p1449_p3)  ;;  %v801_v48 = vld [vmem:[#allocation2 + $0x68] sm:$0xff] (!%p1449_p3) }
 0x23b   : > { %1664 = vmatprep.mubr.msk.bf16.mxu0 (!%p1449_p3), %vm705_vm2, %v806_v35  ;;  %1708 = vmatprep.subr.bf16.mxu1 (!%p1449_p3), %v1915_v40  ;;  %v1918_v49 = vld [vmem:[#allocation12 + $0x18] sm:$0xff] (!%p1449_p3)   ;;  %v809_v50 = vpack.c.bf16 (!%p1449_p3), %v799_v46, %v798_v45  ;;  %v810_v51 = vpack.c.bf16 (!%p1449_p3), %v801_v48, %v800_v47  ;;  %v1919_v52 = vld [vmem:[#allocation12 + $0x20] sm:$0xff] (!%p1449_p3)   ;;  %v802_v53 = vld [vmem:[#allocation2 + $0x70] sm:$0xff] (!%p1449_p3) }
 0x23c   : > { %1677 = vmatpush3.bf16.msra.mxu0 (!%p1449_p3), %v1915_v40  ;;  %1716 = vmatpush3.bf16.msra.mxu1 (!%p1449_p3), %v1915_v40  ;;  %v803_v54 = vld [vmem:[#allocation2 + $0x78] sm:$0xff] (!%p1449_p3)  ;;  %v1920_v55 = vld [vmem:[#allocation12 + $0x28] sm:$0xff] (!%p1449_p3)   ;;  %v1922_v58 = vld [vmem:[#allocation12 + $0x38] sm:$0xff] (!%p1449_p3)  }
 0x23d   : > { %1678 = vmatprep.subr.bf16.mxu0 %v1916_v41  ;;  %1709 = vmatprep.subr.bf16.mxu1 %v1916_v41  ;;  %v811_v56 = vpack.c.bf16 %v803_v54, %v802_v53  ;;  %v1921_v57 = vld [vmem:[#allocation12 + $0x30] sm:$0xff]   ;;  %v1450_v59 = vld [vmem:[#allocation11] ss:$0 sm:$0xff] }
 0x240   : > { %1717 = vmatpush3.bf16.msra.mxu1 %v1916_v41  ;;  %1679 = vmatpush3.bf16.msra.mxu0 %v1916_v41 }
 0x241   : > { %1680 = vmatprep.subr.bf16.mxu0 %v1917_v44  ;;  %1710 = vmatprep.subr.bf16.mxu1 %v1917_v44 }
 0x242   : > { %1665 = vmatmul.mubr.msk.bf16.gmra.mrb[4].mxu0 %vm705_vm2, %v807_v42 }
 0x243   : > { %1668 = vmatprep.mubr.msk.bf16.mxu0 %vm705_vm2, %v808_v43 }
 0x244   : > { %1718 = vmatpush3.bf16.msra.mxu1 %v1917_v44  ;;  %1681 = vmatpush3.bf16.msra.mxu0 %v1917_v44 }
 0x245   : > { %1711 = vmatprep.subr.bf16.mxu1 %v1918_v49  ;;  %1682 = vmatprep.subr.bf16.mxu0 %v1918_v49 }
 0x248   : > { %1719 = vmatpush3.bf16.msra.mxu1 %v1918_v49  ;;  %1683 = vmatpush3.bf16.msra.mxu0 %v1918_v49 }
 0x249   : > { %1684 = vmatprep.subr.bf16.mxu0 %v1919_v52  ;;  %1712 = vmatprep.subr.bf16.mxu1 %v1919_v52 }
 0x24a   : > { %1669 = vmatmul.mubr.msk.bf16.gmra.mrb[8].mxu0 %vm705_vm2, %v809_v50 }
 0x24b   : > { %1672 = vmatprep.mubr.msk.bf16.mxu0 %vm705_vm2, %v810_v51 }
 0x24c   : > { %1720 = vmatpush3.bf16.msra.mxu1 %v1919_v52  ;;  %1685 = vmatpush3.bf16.msra.mxu0 %v1919_v52 }
 0x24d   : > { %1713 = vmatprep.subr.bf16.mxu1 %v1920_v55  ;;  %1686 = vmatprep.subr.bf16.mxu0 %v1920_v55 }
 0x250   : > { %1721 = vmatpush3.bf16.msra.mxu1 %v1920_v55  ;;  %1687 = vmatpush3.bf16.msra.mxu0 %v1920_v55 }
 0x251   : > { %1688 = vmatprep.subr.bf16.mxu0 %v1921_v57  ;;  %1714 = vmatprep.subr.bf16.mxu1 %v1921_v57 }
 0x252   : > { %1673 = vmatmul.mubr.msk.bf16.gmra.mrb[12].mxu0 %vm705_vm2, %v811_v56 }
 0x254   : > { %1689 = vmatpush3.bf16.msra.mxu0 %v1921_v57  ;;  %1722 = vmatpush3.bf16.msra.mxu1 %v1921_v57 }
 0x255   : > { %1690 = vmatprep.subr.bf16.mxu0 %v1922_v58  ;;  %1715 = vmatprep.subr.bf16.mxu1 %v1922_v58 }
 0x258   : > { %1691 = vmatpush3.bf16.msra.mxu0 %v1922_v58  ;;  %1723 = vmatpush3.bf16.msra.mxu1 %v1922_v58 }
 0x30d   : > { %v1662_v60 = vpop.f32.mrb[0].mxu0 }
 0x30e   : > { %v891_v61 = vadd.f32 %v1662_v60, %v1450_v59  ;;  %v882_v62 = vpop.f32.mrb[1].mxu0 }
 0x30f   : > { %v883_v63 = vadd.f32 %v1450_v59, %v882_v62  ;;  %v1663_v0 = vpop.f32.mrb[2].mxu0 }
 0x310   : > { %v894_v1 = vadd.f32 %v1663_v0, %v1450_v59  ;;  %v885_v2 = vpop.f32.mrb[3].mxu0  ;;  %v947_v4 = vmax.f32 %v891_v61, 0.0 }
 0x311   : > { %v886_v3 = vadd.f32 %v1450_v59, %v885_v2  ;;  %v945_v6 = vmax.f32 %v883_v63, 0.0 }
 0x312   : > { %v948_v5 = vmax.f32 %v894_v1, 0.0 }
 0x313   : > { %v946_v7 = vmax.f32 %v886_v3, 0.0 }
 0x314   : > { %v962_v8 = vpack.c.bf16 %v948_v5, %v947_v4 }
 0x315   : > { %v961_v9 = vpack.c.bf16 %v946_v7, %v945_v6  ;;  %v1666_v10 = vpop.f32.mrb[4].mxu0 }
 0x316   : > { %v907_v11 = vadd.f32 %v1666_v10, %v1450_v59  ;;  %v898_v12 = vpop.f32.mrb[5].mxu0 }
 0x317   : > { %v899_v13 = vadd.f32 %v1450_v59, %v898_v12  ;;  %v1667_v14 = vpop.f32.mrb[6].mxu0  ;;  %1692 = vmatprep.mubr.bf16.mxu0 %v961_v9 }
 0x318   : > { %v910_v15 = vadd.f32 %v1667_v14, %v1450_v59  ;;  %v901_v16 = vpop.f32.mrb[7].mxu0  ;;  %1693 = vmatmul.mubr.bf16.vlgmr.msra.gmra.mrb[16].mxu0 %v962_v8  ;;  %v951_v18 = vmax.f32 %v907_v11, 0.0 }
 0x319   : > { %v902_v17 = vadd.f32 %v1450_v59, %v901_v16  ;;  %v949_v20 = vmax.f32 %v899_v13, 0.0 }
 0x31a   : > { %v952_v19 = vmax.f32 %v910_v15, 0.0 }
 0x31b   : > { %v950_v21 = vmax.f32 %v902_v17, 0.0 }
 0x31c   : > { %v964_v22 = vpack.c.bf16 %v952_v19, %v951_v18 }
 0x31d   : > { %v1670_v23 = vpop.f32.mrb[8].mxu0  ;;  %v963_v24 = vpack.c.bf16 %v950_v21, %v949_v20 }
 0x31e   : > { %v923_v25 = vadd.f32 %v1670_v23, %v1450_v59  ;;  %v914_v26 = vpop.f32.mrb[9].mxu0 }
 0x31f   : > { %v915_v27 = vadd.f32 %v1450_v59, %v914_v26  ;;  %v1671_v28 = vpop.f32.mrb[10].mxu0  ;;  %1696 = vmatprep.mubr.bf16.mxu1 %v963_v24 }
 0x320   : > { %v926_v29 = vadd.f32 %v1671_v28, %v1450_v59  ;;  %v917_v30 = vpop.f32.mrb[11].mxu0  ;;  %1697 = vmatmul.mubr.bf16.vlgmr.msra.gmra.mrb[0].mxu1 %v964_v22  ;;  %v955_v32 = vmax.f32 %v923_v25, 0.0 }
 0x321   : > { %v918_v31 = vadd.f32 %v1450_v59, %v917_v30  ;;  %v953_v34 = vmax.f32 %v915_v27, 0.0 }
 0x322   : > { %v956_v33 = vmax.f32 %v926_v29, 0.0 }
 0x323   : > { %v954_v35 = vmax.f32 %v918_v31, 0.0 }
 0x324   : > { %v966_v36 = vpack.c.bf16 %v956_v33, %v955_v32 }
 0x325   : > { %v965_v37 = vpack.c.bf16 %v954_v35, %v953_v34  ;;  %v1674_v38 = vpop.f32.mrb[12].mxu0 }
 0x326   : > { %v939_v39 = vadd.f32 %v1674_v38, %v1450_v59  ;;  %v930_v40 = vpop.f32.mrb[13].mxu0 }
 0x327   : > { %v931_v41 = vadd.f32 %v1450_v59, %v930_v40  ;;  %v1675_v42 = vpop.f32.mrb[14].mxu0  ;;  %1700 = vmatprep.mubr.bf16.mxu1 %v965_v37 }
 0x328   : > { %v942_v43 = vadd.f32 %v1675_v42, %v1450_v59  ;;  %v933_v44 = vpop.f32.mrb[15].mxu0  ;;  %1701 = vmatmul.mubr.bf16.gmra.mrb[4].mxu1 %v966_v36  ;;  %v959_v46 = vmax.f32 %v939_v39, 0.0 }
 0x329   : > { %v934_v45 = vadd.f32 %v1450_v59, %v933_v44  ;;  %v957_v48 = vmax.f32 %v931_v41, 0.0 }
 0x32a   : > { %v960_v47 = vmax.f32 %v942_v43, 0.0 }
 0x32b   : > { %v958_v49 = vmax.f32 %v934_v45, 0.0 }
 0x32c   : > { %v968_v50 = vpack.c.bf16 %v960_v47, %v959_v46 }
 0x32d   : > { %v967_v51 = vpack.c.bf16 %v958_v49, %v957_v48 }
 0x32f   : > { %1704 = vmatprep.mubr.bf16.mxu1 %v967_v51 }
 0x330   : > { %1705 = vmatmul.mubr.bf16.gmra.mrb[8].mxu1 %v968_v50 }
 0x3eb   : > { %v1694_v52 = vpop.f32.mrb[16].mxu0 }
 0x3ec   : > { %v1067_v53 = vpop.f32.mrb[17].mxu0 }
 0x3ed   : > { %v1695_v54 = vpop.f32.mrb[18].mxu0 }
 0x3ee   : > { %v1517_v55 = vpack.c.bf16 %v1695_v54, %v1694_v52  ;;  %v1070_v56 = vpop.f32.mrb[19].mxu0 }
 0x3ef   : > { %v1512_v57 = vpack.c.bf16 %v1070_v56, %v1067_v53 }
 0x3f0   : > { %1549 = vst [vmem:[%s2788_s20 + $0x8] sm:$0xff] %v1517_v55  }
 0x3f1   : > { %1513 = vst [vmem:[%s2788_s20] sm:$0xff] %v1512_v57  }
 0x3f3   : > { %v1698_v58 = vpop.f32.mrb[0].mxu1 }
 0x3f4   : > { %v1083_v59 = vpop.f32.mrb[1].mxu1 }
 0x3f5   : > { %v1699_v60 = vpop.f32.mrb[2].mxu1 }
 0x3f6   : > { %v1527_v61 = vpack.c.bf16 %v1699_v60, %v1698_v58  ;;  %v1086_v62 = vpop.f32.mrb[3].mxu1 }
 0x3f7   : > { %v1522_v63 = vpack.c.bf16 %v1086_v62, %v1083_v59 }
 0x3f8   : > { %1551 = vst [vmem:[%s2788_s20 + $0x18] sm:$0xff] %v1527_v61  }
 0x3f9   : > { %1550 = vst [vmem:[%s2788_s20 + $0x10] sm:$0xff] %v1522_v63  }
 0x3fb   : > { %v1702_v0 = vpop.f32.mrb[4].mxu1 }
 0x3fc   : > { %v1099_v1 = vpop.f32.mrb[5].mxu1 }
 0x3fd   : > { %v1703_v2 = vpop.f32.mrb[6].mxu1 }
 0x3fe   : > { %v1537_v3 = vpack.c.bf16 %v1703_v2, %v1702_v0  ;;  %v1102_v4 = vpop.f32.mrb[7].mxu1 }
 0x3ff   : > { %v1532_v5 = vpack.c.bf16 %v1102_v4, %v1099_v1 }
 0x400   : > { %1553 = vst [vmem:[%s2788_s20 + $0x28] sm:$0xff] %v1537_v3  }
 0x401   : > { %1552 = vst [vmem:[%s2788_s20 + $0x20] sm:$0xff] %v1532_v5  }
 0x403   : > { %v1706_v6 = vpop.f32.mrb[8].mxu1 }
 0x404   : > { %v1115_v7 = vpop.f32.mrb[9].mxu1 }
 0x405   : > { %v1707_v8 = vpop.f32.mrb[10].mxu1 }
 0x406   : > { %v1547_v9 = vpack.c.bf16 %v1707_v8, %v1706_v6  ;;  %v1118_v10 = vpop.f32.mrb[11].mxu1 }
 0x407   : > { %v1542_v11 = vpack.c.bf16 %v1118_v10, %v1115_v7 }
 0x408   : > { %1555 = vst [vmem:[%s2788_s20 + $0x38] sm:$0xff] %v1547_v9  }
 0x409   : > { %1554 = vst [vmem:[%s2788_s20 + $0x30] sm:$0xff] %v1542_v11  }
 0x40a PF: > { %s3060_s30 = sld [smem:[#allocation27_spill]]  ;;  %s1224_s27 = sshll.u32 %s2788_s20, 4  ;;  %s2872_s27 = int_to_ptr.vmem [resolvable:$true] %s1224_s27 }
 0x40b   : > { %s3061_s16 = sld [smem:[#allocation36_spill]]  ;;  %s1211_s7 = scalar_lea.sflag [#allocation5], %s2748_s23 }
 0x40c   : > { %s2097_s10 = scalar_lea.vmem %s2872_s27, 1024  ;;  %p3062_p2 = scmp.ne.s32.totalorder %s3038_s22, 0 }
 0x40d   : > { %p2098_p13 = scmp.ne.s32.totalorder %s2872_s27, %s2097_s10  ;;  %s2303_s18 = smov [#allocation14]  }
 0x40e   : > { %s2101_s3 = sshll.u32 %s2303_s18, 4  ;;  %s2102_s3 = int_to_ptr.vmem [resolvable:$false] %s2101_s3 }
 0x40f   : > { %p2099_p12 = pnand %p2098_p13, %p3062_p2  ;;  %s2103_s6 = scalar_lea.vmem %s2102_s3, 2048 }
 0x410   : > { %s1508_s19 = sshll.u32 %s3060_s30, 10  ;;  %p2104_p8 = scmp.lt.s32.totalorder %s2872_s27, %s2102_s3 }
 0x411   : > { %s2869_s11 = scalar_lea.hbm %s3061_s16, %s1508_s19  ;;  %p2100_p6 = pneg %p2099_p12 }
 0x412   : > { %p2105_p4 = scmp.lt.s32.totalorder %s2103_s6, %s2097_s10 }
 0x414   : > { %p2106_p9 = por %p2105_p4, %p2104_p8 }
 0x416   : > { %p2107_p11 = pnand %p2106_p9, %p2100_p6 }
 0x418   : > { %2110 = shalt.err (!%p2107_p11)
}
 0x419   : > { %s2111_s20 = scalar_lea.hbm %s2869_s11, 1024  ;;  %s2115_s28 = scalar_lea.hbm %s3061_s16, 2048 }
 0x41a   : > { %p2112_p5 = scmp.ne.s32.totalorder %s2869_s11, %s2111_s20  ;;  %p2116_p7 = scmp.lt.u32.totalorder %s2869_s11, %s3061_s16 }
 0x41b   : > { %p2117_p1 = scmp.lt.u32.totalorder %s2115_s28, %s2111_s20  ;;  %p2119_p13 = scmp.lt.u32.totalorder %s2111_s20, %s2869_s11 }
 0x41c   : > { %p2113_p10 = pnand %p2112_p5, %p3062_p2 }
 0x41d   : > { %p2118_p3 = por %p2117_p1, %p2116_p7 }
 0x41e   : > { %p2114_p0 = pneg %p2113_p10 }
 0x41f   : > { %p2120_p12 = por %p2119_p13, %p2118_p3 }
 0x421   : > { %p2121_p6 = pnand %p2120_p12, %p2114_p0 }
 0x423   : > { %2124 = shalt.err (!%p2121_p6)
}
 0x424   : > { %s2304_s10 = smov 64   ;;  %s2305_s3 = smov 4  }
 0x425   : > { %1743 = dma.vmem_to_hbm [thread:$0]  (%p3062_p2), %s2872_s27, 1024, %s2869_s11, %s1211_s7, %s2304_s10, %s2304_s10, %s2305_s3  }
 0x426   : > { %s2306_s6 = smov [#allocation15]   ;;  %p3063_p4 = scmp.eq.s32.totalorder %s2418_s15, 3 }
 0x427   : > { %s1238_s30 = sshll.u32 %s2306_s6, 4  ;;  %s1239_s30 = int_to_ptr.vmem [resolvable:$true] %s1238_s30 }
 0x428   : > { %s2125_s19 = scalar_lea.vmem %s1239_s30, 64  ;;  %p2132_p5 = scmp.lt.s32.totalorder %s1239_s30, %s1239_s30 }
 0x429   : > { %p2126_p8 = scmp.ne.s32.totalorder %s1239_s30, %s2125_s19  ;;  %p2133_p10 = scmp.lt.s32.totalorder %s2125_s19, %s2125_s19 }
 0x42b   : > { %p2127_p9 = pnand %p2126_p8, %p3063_p4  ;;  %p2134_p0 = por %p2133_p10, %p2132_p5 }
 0x42d   : > { %p2128_p11 = pneg %p2127_p9 }
 0x42f   : > { %p2135_p7 = pnand %p2134_p0, %p2128_p11 }
 0x431   : > { %2138 = shalt.err (!%p2135_p7)
}
 0x432   : > { %s3064_s2 = sld [smem:[#allocation37_spill]]  ;;  %p3065_p1 = pmov %p3063_p4 }
 0x438   : > { %s2139_s22 = scalar_lea.hbm %s3064_s2, 64 }
 0x439   : > { %p2140_p2 = scmp.ne.s32.totalorder %s3064_s2, %s2139_s22  ;;  %p2145_p12 = scmp.lt.u32.totalorder %s2139_s22, %s3064_s2 }
 0x43b   : > { %p2141_p3 = pnand %p2140_p2, %p3065_p1 }
 0x43d   : > { %p2142_p13 = pneg %p2141_p3 }
 0x43f   : > { %p2147_p6 = pnand %p2145_p12, %p2142_p13 }
 0x441   : > { %2150 = shalt.err (!%p2147_p6)
}
 0x442   : > { %p3066_p8 = pmov %p3065_p1  ;;  %p3067_p4 = pmov %p3065_p1 }
 0x444   : > { %1745 = dma.vmem_to_hbm [thread:$0]  (%p3066_p8), %s1239_s30, 64, %s3064_s2, [#allocation16]  }
 0x445   : > { %2228 = dma.done.wait (%p3067_p4), [#allocation16], 64   ;;  %p3068_p9 = pmov %p3065_p1 }
 0x447   : > { %2230 = vsyncadd (%p3068_p9), [#allocation16], 4294967232 }
 0x448 PF: > { %p1782_p11 = scmp.ge.s32.totalorder %s2289_s14, 2  ;;  %s1254_s3 = sand.u32 1, %s2237_s24  }
 0x449   : > { %p3069_p5 = scmp.ne.s32.totalorder %s3039_s21, 0  ;;  %s1255_s6 = scalar_lea.sflag [#allocation5], %s1254_s3 }
 0x44b   : > { %p1770_p10 = pnand %p1782_p11, %p3069_p5 }
 0x44d   : > { %2232 = dma.done.wait (!%p1770_p10), %s1255_s6, 1024  }
 0x44e   : > { %2234 = vsyncadd (!%p1770_p10), %s1255_s6, 4294966272  ;;  %s30_s14 = sadd.s32 1, %s2289_s14   ;;  %s3071_s27 = sld [smem:[#allocation24_spill]] }
 0x44f   : > { %p2925_p0 = scmp.ge.s32.totalorder %s30_s14, 6   ;;  %s3072_s28 = sld [smem:[#allocation25_spill]] }
 0x450   : > { %s3073_s15 = sld [smem:[#allocation31_spill]]  ;;  %s3074_s21 = sld [smem:[#allocation29_spill]] }
 0x451   : > { %s3075_s19 = sld [smem:[#allocation30_spill]]  ;;  %s3077_s24 = smov %s2241_s25 }
 0x452   : > { %s3078_s25 = smov %s2245_s26  ;;  %s3079_s26 = smov %s2660_s29 }
 0x453   : > { %s3081_s30 = smov %s2265_s8  ;;  %s3082_s8 = smov %s2269_s9 }
 0x454   : > { %s3083_s9 = smov %s2596_s17  ;;  %s3084_s10 = smov %s2281_s12 }
 0x455   : > { %s3085_s11 = smov %s2285_s13  ;;  %29 = sbr.rel (!%p2925_p0) target bundleno = 21 (0x15), region = 151 }
 0x456   : > { %s3080_s29 = smov %s3073_s15  ;;  %s3086_s12 = smov %s3074_s21 }
 0x457   : > { %s3087_s13 = smov %s3075_s19 }
 0x45c   :  { %1260 = vsyncpa [#allocation4], 1 }
 0x45d   :  { %1262 = vsyncpa [#allocation4 + $0x1], 1 }
 0x45e   :  { %1263 = vsyncpa [#allocation7], 1 }
 0x45f   :  { %1265 = vsyncpa [#allocation7 + $0x1], 1 }
 0x460   :  { %1266 = vsyncpa [#allocation10], 1 }
 0x461   :  { %1267 = vsyncpa [#allocation13], 1 }
 0x462   :  { %1268 = vsyncpa [#allocation5], 1 }
 0x463   :  { %1270 = vsyncpa [#allocation5 + $0x1], 1 }
 0x464   :  { %1271 = vsyncpa [#allocation16], 1 }

</bundles_post_ra>
